<compile_context>
chip_gen: v5e
topology: v5e:2x2
jax: 0.10.0
libtpu: 0.0.40
codegen_flags: <defaults>
</compile_context>

<pallas_src>
import functools

import jax
import jax.numpy as jnp
from jax.experimental import pallas as pl
from jax.experimental.pallas import tpu as pltpu


def _round_up(a, b):
    return (a + b - 1) // b * b


def _paiconv_kernel(x_rel_ref, feats_ref, featpt_ref, wperm_ref, onepad_ref,
                    w_ref, shift_ref, out_ref, *, k, num_kernel, num_feat,
                    residual, neg_slope):
    M = num_kernel
    F = num_feat
    TP = out_ref.shape[-1]

    # permatrix = x_relative @ kernels + one_padding, channel-major.
    # One MXU matmul against a block-diagonal (k*M, k*3) weight; row = ki*M + m.
    xr = x_rel_ref[...].astype(jnp.float32)                        # (k*3, TP)
    perm = jnp.dot(wperm_ref[...], xr,
                   preferred_element_type=jnp.float32)             # (k*M, TP)
    perm = perm + onepad_ref[...]                                  # (k*M, 1) bcast

    # TODO(synk): `topkmax` is not defined in the provided snippet; using the
    # common PaiConv definition: ReLU followed by L1-normalisation over the k axis.
    perm = jnp.maximum(perm, 0.0)
    denom = perm[0:M, :]
    for ki in range(1, k):
        denom = denom + perm[ki * M:(ki + 1) * M, :]
    inv = pl.reciprocal(denom + 1e-6, approx=True)                 # (M, TP), EUP

    # feats.permute(0,2,1) @ permatrix  ->  per-point multiply-reduce over k,
    # accumulated lane-dense as M blocks of (F, TP); agg row index = m*F + f.
    acc = [jnp.zeros((F, TP), jnp.float32) for _ in range(M)]
    for ki in range(k):
        f_ki = feats_ref[ki].astype(jnp.float32)                   # (F, TP)
        base = ki * M
        for m in range(M):
            w_km = perm[base + m:base + m + 1, :] * inv[m:m + 1, :]  # (1, TP)
            acc[m] = acc[m] + f_ki * w_km                            # (F, TP)
    agg = jnp.concatenate(acc, axis=0)                             # (M*F, TP)

    # TODO(synk): `BasicConv` is not defined in the snippet; implemented as
    # Conv2d(1x1, bias) + BatchNorm2d(eval) + LeakyReLU(0.2).  The BN scale is
    # pre-multiplied into the conv weight and bias+BN shift folded into shift.
    y = jnp.dot(w_ref[...], agg, preferred_element_type=jnp.float32)  # (out_c, TP)
    y = y + shift_ref[...]                                         # (out_c, 1) bcast
    y = jnp.where(y > 0, y, neg_slope * y)                         # LeakyReLU(0.2)
    if residual:                                                   # in_c == out_c
        y = y + featpt_ref[...]
    out_ref[...] = y.astype(out_ref.dtype)


def _gather_channels(arr, idx, k):
    """arr: (B, C, P); idx: (B, k, P) int32 -> (B, k, C, P),
    out[b, i, c, p] = arr[b, c, idx[b, i, p]].  Plain-JAX glue (XLA gather)."""
    B, C, P = arr.shape
    shape = (B, k, C, P)
    arr_b = jnp.broadcast_to(arr[:, None, :, :], shape)
    idx_b = jnp.broadcast_to(idx[:, :, None, :], shape)
    return jnp.take_along_axis(arr_b, idx_b, axis=3)


def pai_conv_forward(x, feature, neigh_indexs, params, *, k, num_kernel,
                     dilation=1, tile_p=512):
    """x: (B, 3, P), feature: (B, in_c, P), neigh_indexs: (B, P, >=k*dilation) int.
    Returns (B, out_c, P) -- same convention as the PyTorch module."""
    B, _, P = x.shape
    F_ = feature.shape[1]
    M = num_kernel
    conv_w = params["conv_w"]                          # (out_c, in_c*M), c = f*M + m
    out_c = conv_w.shape[0]

    # ---------------- glue: neighbor gather / padding in plain JAX ----------------
    ni = neigh_indexs[:, :, :k * dilation:dilation].astype(jnp.int32)   # (B, P, k)
    ni_t = jnp.transpose(ni, (0, 2, 1))                                  # (B, k, P)

    tile_p = max(128, _round_up(tile_p, 128))
    TP = min(tile_p, _round_up(P, 128))
    P_pad = _round_up(P, TP)
    if P_pad != P:
        pad = P_pad - P
        x = jnp.pad(x, ((0, 0), (0, 0), (0, pad)))
        feature = jnp.pad(feature, ((0, 0), (0, 0), (0, pad)))
        ni_t = jnp.pad(ni_t, ((0, 0), (0, 0), (0, pad)))   # index 0 is always valid

    x_nbr = _gather_channels(x, ni_t, k)                                 # (B, k, 3, Pp)
    x_rel = (x_nbr - x_nbr[:, 0:1, :, :]).reshape(B, k * 3, P_pad)
    x_rel = x_rel.astype(jnp.bfloat16)                                   # (B, k*3, Pp)
    feats_nbr = _gather_channels(feature, ni_t, k).astype(jnp.bfloat16)  # (B, k, F, Pp)
    featpt = feature.astype(jnp.float32)                                 # (B, F, Pp)

    # ---------------- fold small parameters once at trace time ----------------
    kernels = params["kernels"].astype(jnp.float32)                      # (3, M)
    eye_k = jnp.eye(k, dtype=jnp.float32)
    # W_perm[ki*M + m, kj*3 + d] = kernels[d, m] * delta(ki, kj)
    w_perm = (eye_k[:, None, :, None] * kernels.T[None, :, None, :])     # (k, M, k, 3)
    w_perm = w_perm.reshape(k * M, k * 3)
    onepad = params["one_padding"].reshape(k * M, 1).astype(jnp.float32)

    bn_eps = 1e-5
    scale = params["bn_gamma"] / jnp.sqrt(params["bn_var"] + bn_eps)     # (out_c,)
    shift = params["bn_beta"] + (params["conv_b"] - params["bn_mean"]) * scale
    # Kernel builds agg with row index m*F + f -> permute conv_w (c = f*M + m) once.
    w_mf = conv_w.reshape(out_c, F_, M).transpose(0, 2, 1).reshape(out_c, M * F_)
    w_fold = (w_mf * scale[:, None]).astype(jnp.float32)                 # (out_c, M*F)
    shift_col = shift.reshape(out_c, 1).astype(jnp.float32)

    residual = (F_ == out_c)
    kernel = functools.partial(_paiconv_kernel, k=k, num_kernel=M, num_feat=F_,
                               residual=residual, neg_slope=0.2)

    grid = (B, P_pad // TP)
    out_full = pl.pallas_call(
        kernel,
        out_shape=jax.ShapeDtypeStruct((B, out_c, P_pad), jnp.float32),
        grid_spec=pltpu.PrefetchScalarGridSpec(
            num_scalar_prefetch=0,
            grid=grid,
            in_specs=[
                pl.BlockSpec((None, k * 3, TP), lambda b, i: (b, 0, i)),
                pl.BlockSpec((None, k, F_, TP), lambda b, i: (b, 0, 0, i)),
                pl.BlockSpec((None, F_, TP), lambda b, i: (b, 0, i)),
                pl.BlockSpec((k * M, k * 3), lambda b, i: (0, 0)),
                pl.BlockSpec((k * M, 1), lambda b, i: (0, 0)),
                pl.BlockSpec((out_c, M * F_), lambda b, i: (0, 0)),
                pl.BlockSpec((out_c, 1), lambda b, i: (0, 0)),
            ],
            out_specs=pl.BlockSpec((None, out_c, TP), lambda b, i: (b, 0, i)),
        ),
        compiler_params=pltpu.CompilerParams(
            dimension_semantics=("parallel", "parallel")),
    )(x_rel, feats_nbr, featpt, w_perm, onepad, w_fold, shift_col)

    return out_full[:, :, :P]                                            # (B, out_c, P)


if __name__ == "__main__":
    key = jax.random.PRNGKey(0)
    ks = jax.random.split(key, 8)

    B, P = 2, 200                      # P not a multiple of 128 -> exercises padding
    in_c = out_c = 16
    k, num_kernel, dilation = 8, 8, 1
    n_neigh = 16                       # kNN table wider than k*dilation

    x = jax.random.normal(ks[0], (B, 3, P), jnp.float32)
    feature = jax.random.normal(ks[1], (B, in_c, P), jnp.float32)
    neigh_indexs = jax.random.randint(ks[2], (B, P, n_neigh), 0, P, dtype=jnp.int32)
    # first neighbor is the point itself (what kNN would produce)
    neigh_indexs = neigh_indexs.at[:, :, 0].set(jnp.arange(P, dtype=jnp.int32)[None, :])

    M = num_kernel
    fan_in = in_c * M
    params = dict(
        kernels=0.1 * jax.random.normal(ks[3], (3, M), jnp.float32),
        one_padding=jnp.zeros((k, M), jnp.float32).at[0, 0].set(1.0),
        conv_w=jax.random.normal(ks[4], (out_c, fan_in), jnp.float32) / jnp.sqrt(fan_in),
        conv_b=0.01 * jax.random.normal(ks[5], (out_c,), jnp.float32),
        bn_gamma=jnp.ones((out_c,), jnp.float32),
        bn_beta=jnp.zeros((out_c,), jnp.float32),
        bn_mean=jnp.zeros((out_c,), jnp.float32),
        bn_var=jnp.ones((out_c,), jnp.float32),
    )

    out = pai_conv_forward(x, feature, neigh_indexs, params,
                           k=k, num_kernel=num_kernel, dilation=dilation)
    jax.block_until_ready(out)
    assert out.shape == (B, out_c, P) and out.dtype == jnp.float32
    print("KERNEL_OK")
</pallas_src>

<mosaic_0001>
module attributes {stable_mosaic.version = 11 : i64} {
  func.func @_paiconv_kernel(%arg0: i32, %arg1: i32, %arg2: memref<1x24x256xbf16, #tpu.memory_space<vmem>>, %arg3: memref<1x8x16x256xbf16, #tpu.memory_space<vmem>>, %arg4: memref<1x16x256xf32, #tpu.memory_space<vmem>>, %arg5: memref<64x24xf32, #tpu.memory_space<vmem>>, %arg6: memref<64x1xf32, #tpu.memory_space<vmem>>, %arg7: memref<16x128xf32, #tpu.memory_space<vmem>>, %arg8: memref<16x1xf32, #tpu.memory_space<vmem>>, %arg9: memref<1x16x256xf32, #tpu.memory_space<vmem>>) attributes {dimension_semantics = [#tpu.dimension_semantics<parallel>, #tpu.dimension_semantics<parallel>], iteration_bounds = array<i64: 2, 1>, scalar_prefetch = 0 : i64, scratch_operands = 0 : i64, tpu.core_type = #tpu.core_type<tc>, window_params = [{transform_indices = @transform_0, window_bounds = array<i64: 1, 24, 256>}, {transform_indices = @transform_1, window_bounds = array<i64: 1, 8, 16, 256>}, {transform_indices = @transform_2, window_bounds = array<i64: 1, 16, 256>}, {pipeline_mode = #tpu.pipeline_mode<synchronous>, transform_indices = @transform_3, window_bounds = array<i64: 64, 24>}, {pipeline_mode = #tpu.pipeline_mode<synchronous>, transform_indices = @transform_4, window_bounds = array<i64: 64, 1>}, {pipeline_mode = #tpu.pipeline_mode<synchronous>, transform_indices = @transform_5, window_bounds = array<i64: 16, 128>}, {pipeline_mode = #tpu.pipeline_mode<synchronous>, transform_indices = @transform_6, window_bounds = array<i64: 16, 1>}, {transform_indices = @transform_7, window_bounds = array<i64: 1, 16, 256>}]} {
    %c0 = arith.constant 0 : index
    %c0_0 = arith.constant 0 : index
    %c0_1 = arith.constant 0 : index
    %0 = vector.load %arg2[%c0, %c0_0, %c0_1] : memref<1x24x256xbf16, #tpu.memory_space<vmem>>, vector<1x24x256xbf16>
    %1 = vector.shape_cast %0 : vector<1x24x256xbf16> to vector<24x256xbf16>
    %2 = arith.extf %1 : vector<24x256xbf16> to vector<24x256xf32>
    %c0_2 = arith.constant 0 : index
    %c0_3 = arith.constant 0 : index
    %3 = vector.load %arg5[%c0_2, %c0_3] : memref<64x24xf32, #tpu.memory_space<vmem>>, vector<64x24xf32>
    %cst = arith.constant dense<0.000000e+00> : vector<64x256xf32>
    %4 = tpu.matmul %3, %2, %cst {dimension_numbers = #tpu.dot_dimension_numbers<[1], [0], [0], [1], [0, 0, 1, 1], [], []>} : vector<64x24xf32>, vector<24x256xf32>, vector<64x256xf32> -> vector<64x256xf32>
    %c0_4 = arith.constant 0 : index
    %c0_5 = arith.constant 0 : index
    %5 = vector.load %arg6[%c0_4, %c0_5] : memref<64x1xf32, #tpu.memory_space<vmem>>, vector<64x1xf32>
    %6 = vector.broadcast %5 : vector<64x1xf32> to vector<64x256xf32>
    %7 = arith.addf %4, %6 : vector<64x256xf32>
    %cst_6 = arith.constant 0.000000e+00 : f32
    %8 = vector.broadcast %cst_6 : f32 to vector<64x256xf32>
    %9 = arith.maximumf %7, %8 : vector<64x256xf32>
    %10 = vector.extract_strided_slice %9 {offsets = [0, 0], sizes = [8, 256], strides = [1, 1]} : vector<64x256xf32> to vector<8x256xf32>
    %11 = vector.extract_strided_slice %9 {offsets = [8, 0], sizes = [8, 256], strides = [1, 1]} : vector<64x256xf32> to vector<8x256xf32>
    %12 = arith.addf %10, %11 : vector<8x256xf32>
    %13 = vector.extract_strided_slice %9 {offsets = [16, 0], sizes = [8, 256], strides = [1, 1]} : vector<64x256xf32> to vector<8x256xf32>
    %14 = arith.addf %12, %13 : vector<8x256xf32>
    %15 = vector.extract_strided_slice %9 {offsets = [24, 0], sizes = [8, 256], strides = [1, 1]} : vector<64x256xf32> to vector<8x256xf32>
    %16 = arith.addf %14, %15 : vector<8x256xf32>
    %17 = vector.extract_strided_slice %9 {offsets = [32, 0], sizes = [8, 256], strides = [1, 1]} : vector<64x256xf32> to vector<8x256xf32>
    %18 = arith.addf %16, %17 : vector<8x256xf32>
    %19 = vector.extract_strided_slice %9 {offsets = [40, 0], sizes = [8, 256], strides = [1, 1]} : vector<64x256xf32> to vector<8x256xf32>
    %20 = arith.addf %18, %19 : vector<8x256xf32>
    %21 = vector.extract_strided_slice %9 {offsets = [48, 0], sizes = [8, 256], strides = [1, 1]} : vector<64x256xf32> to vector<8x256xf32>
    %22 = arith.addf %20, %21 : vector<8x256xf32>
    %23 = vector.extract_strided_slice %9 {offsets = [56, 0], sizes = [8, 256], strides = [1, 1]} : vector<64x256xf32> to vector<8x256xf32>
    %24 = arith.addf %22, %23 : vector<8x256xf32>
    %cst_7 = arith.constant 9.99999997E-7 : f32
    %25 = vector.broadcast %cst_7 : f32 to vector<8x256xf32>
    %26 = arith.addf %24, %25 : vector<8x256xf32>
    %27 = tpu.reciprocal %26 {approx = true} : vector<8x256xf32> -> vector<8x256xf32>
    %cst_8 = arith.constant 0.000000e+00 : f32
    %28 = vector.broadcast %cst_8 : f32 to vector<16x256xf32>
    %cst_9 = arith.constant 0.000000e+00 : f32
    %29 = vector.broadcast %cst_9 : f32 to vector<16x256xf32>
    %cst_10 = arith.constant 0.000000e+00 : f32
    %30 = vector.broadcast %cst_10 : f32 to vector<16x256xf32>
    %cst_11 = arith.constant 0.000000e+00 : f32
    %31 = vector.broadcast %cst_11 : f32 to vector<16x256xf32>
    %cst_12 = arith.constant 0.000000e+00 : f32
    %32 = vector.broadcast %cst_12 : f32 to vector<16x256xf32>
    %cst_13 = arith.constant 0.000000e+00 : f32
    %33 = vector.broadcast %cst_13 : f32 to vector<16x256xf32>
    %cst_14 = arith.constant 0.000000e+00 : f32
    %34 = vector.broadcast %cst_14 : f32 to vector<16x256xf32>
    %cst_15 = arith.constant 0.000000e+00 : f32
    %35 = vector.broadcast %cst_15 : f32 to vector<16x256xf32>
    %c0_16 = arith.constant 0 : index
    %c0_17 = arith.constant 0 : index
    %c0_18 = arith.constant 0 : index
    %c0_19 = arith.constant 0 : index
    %36 = vector.load %arg3[%c0_16, %c0_17, %c0_18, %c0_19] : memref<1x8x16x256xbf16, #tpu.memory_space<vmem>>, vector<1x1x16x256xbf16>
    %37 = vector.shape_cast %36 : vector<1x1x16x256xbf16> to vector<16x256xbf16>
    %38 = arith.extf %37 : vector<16x256xbf16> to vector<16x256xf32>
    %39 = vector.extract_strided_slice %9 {offsets = [0, 0], sizes = [1, 256], strides = [1, 1]} : vector<64x256xf32> to vector<1x256xf32>
    %40 = vector.extract_strided_slice %27 {offsets = [0, 0], sizes = [1, 256], strides = [1, 1]} : vector<8x256xf32> to vector<1x256xf32>
    %41 = arith.mulf %39, %40 : vector<1x256xf32>
    %42 = vector.broadcast %41 : vector<1x256xf32> to vector<16x256xf32>
    %43 = arith.mulf %38, %42 : vector<16x256xf32>
    %44 = arith.addf %28, %43 : vector<16x256xf32>
    %45 = vector.extract_strided_slice %9 {offsets = [1, 0], sizes = [1, 256], strides = [1, 1]} : vector<64x256xf32> to vector<1x256xf32>
    %46 = vector.extract_strided_slice %27 {offsets = [1, 0], sizes = [1, 256], strides = [1, 1]} : vector<8x256xf32> to vector<1x256xf32>
    %47 = arith.mulf %45, %46 : vector<1x256xf32>
    %48 = vector.broadcast %47 : vector<1x256xf32> to vector<16x256xf32>
    %49 = arith.mulf %38, %48 : vector<16x256xf32>
    %50 = arith.addf %29, %49 : vector<16x256xf32>
    %51 = vector.extract_strided_slice %9 {offsets = [2, 0], sizes = [1, 256], strides = [1, 1]} : vector<64x256xf32> to vector<1x256xf32>
    %52 = vector.extract_strided_slice %27 {offsets = [2, 0], sizes = [1, 256], strides = [1, 1]} : vector<8x256xf32> to vector<1x256xf32>
    %53 = arith.mulf %51, %52 : vector<1x256xf32>
    %54 = vector.broadcast %53 : vector<1x256xf32> to vector<16x256xf32>
    %55 = arith.mulf %38, %54 : vector<16x256xf32>
    %56 = arith.addf %30, %55 : vector<16x256xf32>
    %57 = vector.extract_strided_slice %9 {offsets = [3, 0], sizes = [1, 256], strides = [1, 1]} : vector<64x256xf32> to vector<1x256xf32>
    %58 = vector.extract_strided_slice %27 {offsets = [3, 0], sizes = [1, 256], strides = [1, 1]} : vector<8x256xf32> to vector<1x256xf32>
    %59 = arith.mulf %57, %58 : vector<1x256xf32>
    %60 = vector.broadcast %59 : vector<1x256xf32> to vector<16x256xf32>
    %61 = arith.mulf %38, %60 : vector<16x256xf32>
    %62 = arith.addf %31, %61 : vector<16x256xf32>
    %63 = vector.extract_strided_slice %9 {offsets = [4, 0], sizes = [1, 256], strides = [1, 1]} : vector<64x256xf32> to vector<1x256xf32>
    %64 = vector.extract_strided_slice %27 {offsets = [4, 0], sizes = [1, 256], strides = [1, 1]} : vector<8x256xf32> to vector<1x256xf32>
    %65 = arith.mulf %63, %64 : vector<1x256xf32>
    %66 = vector.broadcast %65 : vector<1x256xf32> to vector<16x256xf32>
    %67 = arith.mulf %38, %66 : vector<16x256xf32>
    %68 = arith.addf %32, %67 : vector<16x256xf32>
    %69 = vector.extract_strided_slice %9 {offsets = [5, 0], sizes = [1, 256], strides = [1, 1]} : vector<64x256xf32> to vector<1x256xf32>
    %70 = vector.extract_strided_slice %27 {offsets = [5, 0], sizes = [1, 256], strides = [1, 1]} : vector<8x256xf32> to vector<1x256xf32>
    %71 = arith.mulf %69, %70 : vector<1x256xf32>
    %72 = vector.broadcast %71 : vector<1x256xf32> to vector<16x256xf32>
    %73 = arith.mulf %38, %72 : vector<16x256xf32>
    %74 = arith.addf %33, %73 : vector<16x256xf32>
    %75 = vector.extract_strided_slice %9 {offsets = [6, 0], sizes = [1, 256], strides = [1, 1]} : vector<64x256xf32> to vector<1x256xf32>
    %76 = vector.extract_strided_slice %27 {offsets = [6, 0], sizes = [1, 256], strides = [1, 1]} : vector<8x256xf32> to vector<1x256xf32>
    %77 = arith.mulf %75, %76 : vector<1x256xf32>
    %78 = vector.broadcast %77 : vector<1x256xf32> to vector<16x256xf32>
    %79 = arith.mulf %38, %78 : vector<16x256xf32>
    %80 = arith.addf %34, %79 : vector<16x256xf32>
    %81 = vector.extract_strided_slice %9 {offsets = [7, 0], sizes = [1, 256], strides = [1, 1]} : vector<64x256xf32> to vector<1x256xf32>
    %82 = vector.extract_strided_slice %27 {offsets = [7, 0], sizes = [1, 256], strides = [1, 1]} : vector<8x256xf32> to vector<1x256xf32>
    %83 = arith.mulf %81, %82 : vector<1x256xf32>
    %84 = vector.broadcast %83 : vector<1x256xf32> to vector<16x256xf32>
    %85 = arith.mulf %38, %84 : vector<16x256xf32>
    %86 = arith.addf %35, %85 : vector<16x256xf32>
    %c0_20 = arith.constant 0 : index
    %c1 = arith.constant 1 : index
    %c0_21 = arith.constant 0 : index
    %c0_22 = arith.constant 0 : index
    %87 = vector.load %arg3[%c0_20, %c1, %c0_21, %c0_22] : memref<1x8x16x256xbf16, #tpu.memory_space<vmem>>, vector<1x1x16x256xbf16>
    %88 = vector.shape_cast %87 : vector<1x1x16x256xbf16> to vector<16x256xbf16>
    %89 = arith.extf %88 : vector<16x256xbf16> to vector<16x256xf32>
    %90 = vector.extract_strided_slice %9 {offsets = [8, 0], sizes = [1, 256], strides = [1, 1]} : vector<64x256xf32> to vector<1x256xf32>
    %91 = vector.extract_strided_slice %27 {offsets = [0, 0], sizes = [1, 256], strides = [1, 1]} : vector<8x256xf32> to vector<1x256xf32>
    %92 = arith.mulf %90, %91 : vector<1x256xf32>
    %93 = vector.broadcast %92 : vector<1x256xf32> to vector<16x256xf32>
    %94 = arith.mulf %89, %93 : vector<16x256xf32>
    %95 = arith.addf %44, %94 : vector<16x256xf32>
    %96 = vector.extract_strided_slice %9 {offsets = [9, 0], sizes = [1, 256], strides = [1, 1]} : vector<64x256xf32> to vector<1x256xf32>
    %97 = vector.extract_strided_slice %27 {offsets = [1, 0], sizes = [1, 256], strides = [1, 1]} : vector<8x256xf32> to vector<1x256xf32>
    %98 = arith.mulf %96, %97 : vector<1x256xf32>
    %99 = vector.broadcast %98 : vector<1x256xf32> to vector<16x256xf32>
    %100 = arith.mulf %89, %99 : vector<16x256xf32>
    %101 = arith.addf %50, %100 : vector<16x256xf32>
    %102 = vector.extract_strided_slice %9 {offsets = [10, 0], sizes = [1, 256], strides = [1, 1]} : vector<64x256xf32> to vector<1x256xf32>
    %103 = vector.extract_strided_slice %27 {offsets = [2, 0], sizes = [1, 256], strides = [1, 1]} : vector<8x256xf32> to vector<1x256xf32>
    %104 = arith.mulf %102, %103 : vector<1x256xf32>
    %105 = vector.broadcast %104 : vector<1x256xf32> to vector<16x256xf32>
    %106 = arith.mulf %89, %105 : vector<16x256xf32>
    %107 = arith.addf %56, %106 : vector<16x256xf32>
    %108 = vector.extract_strided_slice %9 {offsets = [11, 0], sizes = [1, 256], strides = [1, 1]} : vector<64x256xf32> to vector<1x256xf32>
    %109 = vector.extract_strided_slice %27 {offsets = [3, 0], sizes = [1, 256], strides = [1, 1]} : vector<8x256xf32> to vector<1x256xf32>
    %110 = arith.mulf %108, %109 : vector<1x256xf32>
    %111 = vector.broadcast %110 : vector<1x256xf32> to vector<16x256xf32>
    %112 = arith.mulf %89, %111 : vector<16x256xf32>
    %113 = arith.addf %62, %112 : vector<16x256xf32>
    %114 = vector.extract_strided_slice %9 {offsets = [12, 0], sizes = [1, 256], strides = [1, 1]} : vector<64x256xf32> to vector<1x256xf32>
    %115 = vector.extract_strided_slice %27 {offsets = [4, 0], sizes = [1, 256], strides = [1, 1]} : vector<8x256xf32> to vector<1x256xf32>
    %116 = arith.mulf %114, %115 : vector<1x256xf32>
    %117 = vector.broadcast %116 : vector<1x256xf32> to vector<16x256xf32>
    %118 = arith.mulf %89, %117 : vector<16x256xf32>
    %119 = arith.addf %68, %118 : vector<16x256xf32>
    %120 = vector.extract_strided_slice %9 {offsets = [13, 0], sizes = [1, 256], strides = [1, 1]} : vector<64x256xf32> to vector<1x256xf32>
    %121 = vector.extract_strided_slice %27 {offsets = [5, 0], sizes = [1, 256], strides = [1, 1]} : vector<8x256xf32> to vector<1x256xf32>
    %122 = arith.mulf %120, %121 : vector<1x256xf32>
    %123 = vector.broadcast %122 : vector<1x256xf32> to vector<16x256xf32>
    %124 = arith.mulf %89, %123 : vector<16x256xf32>
    %125 = arith.addf %74, %124 : vector<16x256xf32>
    %126 = vector.extract_strided_slice %9 {offsets = [14, 0], sizes = [1, 256], strides = [1, 1]} : vector<64x256xf32> to vector<1x256xf32>
    %127 = vector.extract_strided_slice %27 {offsets = [6, 0], sizes = [1, 256], strides = [1, 1]} : vector<8x256xf32> to vector<1x256xf32>
    %128 = arith.mulf %126, %127 : vector<1x256xf32>
    %129 = vector.broadcast %128 : vector<1x256xf32> to vector<16x256xf32>
    %130 = arith.mulf %89, %129 : vector<16x256xf32>
    %131 = arith.addf %80, %130 : vector<16x256xf32>
    %132 = vector.extract_strided_slice %9 {offsets = [15, 0], sizes = [1, 256], strides = [1, 1]} : vector<64x256xf32> to vector<1x256xf32>
    %133 = vector.extract_strided_slice %27 {offsets = [7, 0], sizes = [1, 256], strides = [1, 1]} : vector<8x256xf32> to vector<1x256xf32>
    %134 = arith.mulf %132, %133 : vector<1x256xf32>
    %135 = vector.broadcast %134 : vector<1x256xf32> to vector<16x256xf32>
    %136 = arith.mulf %89, %135 : vector<16x256xf32>
    %137 = arith.addf %86, %136 : vector<16x256xf32>
    %c0_23 = arith.constant 0 : index
    %c2 = arith.constant 2 : index
    %c0_24 = arith.constant 0 : index
    %c0_25 = arith.constant 0 : index
    %138 = vector.load %arg3[%c0_23, %c2, %c0_24, %c0_25] : memref<1x8x16x256xbf16, #tpu.memory_space<vmem>>, vector<1x1x16x256xbf16>
    %139 = vector.shape_cast %138 : vector<1x1x16x256xbf16> to vector<16x256xbf16>
    %140 = arith.extf %139 : vector<16x256xbf16> to vector<16x256xf32>
    %141 = vector.extract_strided_slice %9 {offsets = [16, 0], sizes = [1, 256], strides = [1, 1]} : vector<64x256xf32> to vector<1x256xf32>
    %142 = vector.extract_strided_slice %27 {offsets = [0, 0], sizes = [1, 256], strides = [1, 1]} : vector<8x256xf32> to vector<1x256xf32>
    %143 = arith.mulf %141, %142 : vector<1x256xf32>
    %144 = vector.broadcast %143 : vector<1x256xf32> to vector<16x256xf32>
    %145 = arith.mulf %140, %144 : vector<16x256xf32>
    %146 = arith.addf %95, %145 : vector<16x256xf32>
    %147 = vector.extract_strided_slice %9 {offsets = [17, 0], sizes = [1, 256], strides = [1, 1]} : vector<64x256xf32> to vector<1x256xf32>
    %148 = vector.extract_strided_slice %27 {offsets = [1, 0], sizes = [1, 256], strides = [1, 1]} : vector<8x256xf32> to vector<1x256xf32>
    %149 = arith.mulf %147, %148 : vector<1x256xf32>
    %150 = vector.broadcast %149 : vector<1x256xf32> to vector<16x256xf32>
    %151 = arith.mulf %140, %150 : vector<16x256xf32>
    %152 = arith.addf %101, %151 : vector<16x256xf32>
    %153 = vector.extract_strided_slice %9 {offsets = [18, 0], sizes = [1, 256], strides = [1, 1]} : vector<64x256xf32> to vector<1x256xf32>
    %154 = vector.extract_strided_slice %27 {offsets = [2, 0], sizes = [1, 256], strides = [1, 1]} : vector<8x256xf32> to vector<1x256xf32>
    %155 = arith.mulf %153, %154 : vector<1x256xf32>
    %156 = vector.broadcast %155 : vector<1x256xf32> to vector<16x256xf32>
    %157 = arith.mulf %140, %156 : vector<16x256xf32>
    %158 = arith.addf %107, %157 : vector<16x256xf32>
    %159 = vector.extract_strided_slice %9 {offsets = [19, 0], sizes = [1, 256], strides = [1, 1]} : vector<64x256xf32> to vector<1x256xf32>
    %160 = vector.extract_strided_slice %27 {offsets = [3, 0], sizes = [1, 256], strides = [1, 1]} : vector<8x256xf32> to vector<1x256xf32>
    %161 = arith.mulf %159, %160 : vector<1x256xf32>
    %162 = vector.broadcast %161 : vector<1x256xf32> to vector<16x256xf32>
    %163 = arith.mulf %140, %162 : vector<16x256xf32>
    %164 = arith.addf %113, %163 : vector<16x256xf32>
    %165 = vector.extract_strided_slice %9 {offsets = [20, 0], sizes = [1, 256], strides = [1, 1]} : vector<64x256xf32> to vector<1x256xf32>
    %166 = vector.extract_strided_slice %27 {offsets = [4, 0], sizes = [1, 256], strides = [1, 1]} : vector<8x256xf32> to vector<1x256xf32>
    %167 = arith.mulf %165, %166 : vector<1x256xf32>
    %168 = vector.broadcast %167 : vector<1x256xf32> to vector<16x256xf32>
    %169 = arith.mulf %140, %168 : vector<16x256xf32>
    %170 = arith.addf %119, %169 : vector<16x256xf32>
    %171 = vector.extract_strided_slice %9 {offsets = [21, 0], sizes = [1, 256], strides = [1, 1]} : vector<64x256xf32> to vector<1x256xf32>
    %172 = vector.extract_strided_slice %27 {offsets = [5, 0], sizes = [1, 256], strides = [1, 1]} : vector<8x256xf32> to vector<1x256xf32>
    %173 = arith.mulf %171, %172 : vector<1x256xf32>
    %174 = vector.broadcast %173 : vector<1x256xf32> to vector<16x256xf32>
    %175 = arith.mulf %140, %174 : vector<16x256xf32>
    %176 = arith.addf %125, %175 : vector<16x256xf32>
    %177 = vector.extract_strided_slice %9 {offsets = [22, 0], sizes = [1, 256], strides = [1, 1]} : vector<64x256xf32> to vector<1x256xf32>
    %178 = vector.extract_strided_slice %27 {offsets = [6, 0], sizes = [1, 256], strides = [1, 1]} : vector<8x256xf32> to vector<1x256xf32>
    %179 = arith.mulf %177, %178 : vector<1x256xf32>
    %180 = vector.broadcast %179 : vector<1x256xf32> to vector<16x256xf32>
    %181 = arith.mulf %140, %180 : vector<16x256xf32>
    %182 = arith.addf %131, %181 : vector<16x256xf32>
    %183 = vector.extract_strided_slice %9 {offsets = [23, 0], sizes = [1, 256], strides = [1, 1]} : vector<64x256xf32> to vector<1x256xf32>
    %184 = vector.extract_strided_slice %27 {offsets = [7, 0], sizes = [1, 256], strides = [1, 1]} : vector<8x256xf32> to vector<1x256xf32>
    %185 = arith.mulf %183, %184 : vector<1x256xf32>
    %186 = vector.broadcast %185 : vector<1x256xf32> to vector<16x256xf32>
    %187 = arith.mulf %140, %186 : vector<16x256xf32>
    %188 = arith.addf %137, %187 : vector<16x256xf32>
    %c0_26 = arith.constant 0 : index
    %c3 = arith.constant 3 : index
    %c0_27 = arith.constant 0 : index
    %c0_28 = arith.constant 0 : index
    %189 = vector.load %arg3[%c0_26, %c3, %c0_27, %c0_28] : memref<1x8x16x256xbf16, #tpu.memory_space<vmem>>, vector<1x1x16x256xbf16>
    %190 = vector.shape_cast %189 : vector<1x1x16x256xbf16> to vector<16x256xbf16>
    %191 = arith.extf %190 : vector<16x256xbf16> to vector<16x256xf32>
    %192 = vector.extract_strided_slice %9 {offsets = [24, 0], sizes = [1, 256], strides = [1, 1]} : vector<64x256xf32> to vector<1x256xf32>
    %193 = vector.extract_strided_slice %27 {offsets = [0, 0], sizes = [1, 256], strides = [1, 1]} : vector<8x256xf32> to vector<1x256xf32>
    %194 = arith.mulf %192, %193 : vector<1x256xf32>
    %195 = vector.broadcast %194 : vector<1x256xf32> to vector<16x256xf32>
    %196 = arith.mulf %191, %195 : vector<16x256xf32>
    %197 = arith.addf %146, %196 : vector<16x256xf32>
    %198 = vector.extract_strided_slice %9 {offsets = [25, 0], sizes = [1, 256], strides = [1, 1]} : vector<64x256xf32> to vector<1x256xf32>
    %199 = vector.extract_strided_slice %27 {offsets = [1, 0], sizes = [1, 256], strides = [1, 1]} : vector<8x256xf32> to vector<1x256xf32>
    %200 = arith.mulf %198, %199 : vector<1x256xf32>
    %201 = vector.broadcast %200 : vector<1x256xf32> to vector<16x256xf32>
    %202 = arith.mulf %191, %201 : vector<16x256xf32>
    %203 = arith.addf %152, %202 : vector<16x256xf32>
    %204 = vector.extract_strided_slice %9 {offsets = [26, 0], sizes = [1, 256], strides = [1, 1]} : vector<64x256xf32> to vector<1x256xf32>
    %205 = vector.extract_strided_slice %27 {offsets = [2, 0], sizes = [1, 256], strides = [1, 1]} : vector<8x256xf32> to vector<1x256xf32>
    %206 = arith.mulf %204, %205 : vector<1x256xf32>
    %207 = vector.broadcast %206 : vector<1x256xf32> to vector<16x256xf32>
    %208 = arith.mulf %191, %207 : vector<16x256xf32>
    %209 = arith.addf %158, %208 : vector<16x256xf32>
    %210 = vector.extract_strided_slice %9 {offsets = [27, 0], sizes = [1, 256], strides = [1, 1]} : vector<64x256xf32> to vector<1x256xf32>
    %211 = vector.extract_strided_slice %27 {offsets = [3, 0], sizes = [1, 256], strides = [1, 1]} : vector<8x256xf32> to vector<1x256xf32>
    %212 = arith.mulf %210, %211 : vector<1x256xf32>
    %213 = vector.broadcast %212 : vector<1x256xf32> to vector<16x256xf32>
    %214 = arith.mulf %191, %213 : vector<16x256xf32>
    %215 = arith.addf %164, %214 : vector<16x256xf32>
    %216 = vector.extract_strided_slice %9 {offsets = [28, 0], sizes = [1, 256], strides = [1, 1]} : vector<64x256xf32> to vector<1x256xf32>
    %217 = vector.extract_strided_slice %27 {offsets = [4, 0], sizes = [1, 256], strides = [1, 1]} : vector<8x256xf32> to vector<1x256xf32>
    %218 = arith.mulf %216, %217 : vector<1x256xf32>
    %219 = vector.broadcast %218 : vector<1x256xf32> to vector<16x256xf32>
    %220 = arith.mulf %191, %219 : vector<16x256xf32>
    %221 = arith.addf %170, %220 : vector<16x256xf32>
    %222 = vector.extract_strided_slice %9 {offsets = [29, 0], sizes = [1, 256], strides = [1, 1]} : vector<64x256xf32> to vector<1x256xf32>
    %223 = vector.extract_strided_slice %27 {offsets = [5, 0], sizes = [1, 256], strides = [1, 1]} : vector<8x256xf32> to vector<1x256xf32>
    %224 = arith.mulf %222, %223 : vector<1x256xf32>
    %225 = vector.broadcast %224 : vector<1x256xf32> to vector<16x256xf32>
    %226 = arith.mulf %191, %225 : vector<16x256xf32>
    %227 = arith.addf %176, %226 : vector<16x256xf32>
    %228 = vector.extract_strided_slice %9 {offsets = [30, 0], sizes = [1, 256], strides = [1, 1]} : vector<64x256xf32> to vector<1x256xf32>
    %229 = vector.extract_strided_slice %27 {offsets = [6, 0], sizes = [1, 256], strides = [1, 1]} : vector<8x256xf32> to vector<1x256xf32>
    %230 = arith.mulf %228, %229 : vector<1x256xf32>
    %231 = vector.broadcast %230 : vector<1x256xf32> to vector<16x256xf32>
    %232 = arith.mulf %191, %231 : vector<16x256xf32>
    %233 = arith.addf %182, %232 : vector<16x256xf32>
    %234 = vector.extract_strided_slice %9 {offsets = [31, 0], sizes = [1, 256], strides = [1, 1]} : vector<64x256xf32> to vector<1x256xf32>
    %235 = vector.extract_strided_slice %27 {offsets = [7, 0], sizes = [1, 256], strides = [1, 1]} : vector<8x256xf32> to vector<1x256xf32>
    %236 = arith.mulf %234, %235 : vector<1x256xf32>
    %237 = vector.broadcast %236 : vector<1x256xf32> to vector<16x256xf32>
    %238 = arith.mulf %191, %237 : vector<16x256xf32>
    %239 = arith.addf %188, %238 : vector<16x256xf32>
    %c0_29 = arith.constant 0 : index
    %c4 = arith.constant 4 : index
    %c0_30 = arith.constant 0 : index
    %c0_31 = arith.constant 0 : index
    %240 = vector.load %arg3[%c0_29, %c4, %c0_30, %c0_31] : memref<1x8x16x256xbf16, #tpu.memory_space<vmem>>, vector<1x1x16x256xbf16>
    %241 = vector.shape_cast %240 : vector<1x1x16x256xbf16> to vector<16x256xbf16>
    %242 = arith.extf %241 : vector<16x256xbf16> to vector<16x256xf32>
    %243 = vector.extract_strided_slice %9 {offsets = [32, 0], sizes = [1, 256], strides = [1, 1]} : vector<64x256xf32> to vector<1x256xf32>
    %244 = vector.extract_strided_slice %27 {offsets = [0, 0], sizes = [1, 256], strides = [1, 1]} : vector<8x256xf32> to vector<1x256xf32>
    %245 = arith.mulf %243, %244 : vector<1x256xf32>
    %246 = vector.broadcast %245 : vector<1x256xf32> to vector<16x256xf32>
    %247 = arith.mulf %242, %246 : vector<16x256xf32>
    %248 = arith.addf %197, %247 : vector<16x256xf32>
    %249 = vector.extract_strided_slice %9 {offsets = [33, 0], sizes = [1, 256], strides = [1, 1]} : vector<64x256xf32> to vector<1x256xf32>
    %250 = vector.extract_strided_slice %27 {offsets = [1, 0], sizes = [1, 256], strides = [1, 1]} : vector<8x256xf32> to vector<1x256xf32>
    %251 = arith.mulf %249, %250 : vector<1x256xf32>
    %252 = vector.broadcast %251 : vector<1x256xf32> to vector<16x256xf32>
    %253 = arith.mulf %242, %252 : vector<16x256xf32>
    %254 = arith.addf %203, %253 : vector<16x256xf32>
    %255 = vector.extract_strided_slice %9 {offsets = [34, 0], sizes = [1, 256], strides = [1, 1]} : vector<64x256xf32> to vector<1x256xf32>
    %256 = vector.extract_strided_slice %27 {offsets = [2, 0], sizes = [1, 256], strides = [1, 1]} : vector<8x256xf32> to vector<1x256xf32>
    %257 = arith.mulf %255, %256 : vector<1x256xf32>
    %258 = vector.broadcast %257 : vector<1x256xf32> to vector<16x256xf32>
    %259 = arith.mulf %242, %258 : vector<16x256xf32>
    %260 = arith.addf %209, %259 : vector<16x256xf32>
    %261 = vector.extract_strided_slice %9 {offsets = [35, 0], sizes = [1, 256], strides = [1, 1]} : vector<64x256xf32> to vector<1x256xf32>
    %262 = vector.extract_strided_slice %27 {offsets = [3, 0], sizes = [1, 256], strides = [1, 1]} : vector<8x256xf32> to vector<1x256xf32>
    %263 = arith.mulf %261, %262 : vector<1x256xf32>
    %264 = vector.broadcast %263 : vector<1x256xf32> to vector<16x256xf32>
    %265 = arith.mulf %242, %264 : vector<16x256xf32>
    %266 = arith.addf %215, %265 : vector<16x256xf32>
    %267 = vector.extract_strided_slice %9 {offsets = [36, 0], sizes = [1, 256], strides = [1, 1]} : vector<64x256xf32> to vector<1x256xf32>
    %268 = vector.extract_strided_slice %27 {offsets = [4, 0], sizes = [1, 256], strides = [1, 1]} : vector<8x256xf32> to vector<1x256xf32>
    %269 = arith.mulf %267, %268 : vector<1x256xf32>
    %270 = vector.broadcast %269 : vector<1x256xf32> to vector<16x256xf32>
    %271 = arith.mulf %242, %270 : vector<16x256xf32>
    %272 = arith.addf %221, %271 : vector<16x256xf32>
    %273 = vector.extract_strided_slice %9 {offsets = [37, 0], sizes = [1, 256], strides = [1, 1]} : vector<64x256xf32> to vector<1x256xf32>
    %274 = vector.extract_strided_slice %27 {offsets = [5, 0], sizes = [1, 256], strides = [1, 1]} : vector<8x256xf32> to vector<1x256xf32>
    %275 = arith.mulf %273, %274 : vector<1x256xf32>
    %276 = vector.broadcast %275 : vector<1x256xf32> to vector<16x256xf32>
    %277 = arith.mulf %242, %276 : vector<16x256xf32>
    %278 = arith.addf %227, %277 : vector<16x256xf32>
    %279 = vector.extract_strided_slice %9 {offsets = [38, 0], sizes = [1, 256], strides = [1, 1]} : vector<64x256xf32> to vector<1x256xf32>
    %280 = vector.extract_strided_slice %27 {offsets = [6, 0], sizes = [1, 256], strides = [1, 1]} : vector<8x256xf32> to vector<1x256xf32>
    %281 = arith.mulf %279, %280 : vector<1x256xf32>
    %282 = vector.broadcast %281 : vector<1x256xf32> to vector<16x256xf32>
    %283 = arith.mulf %242, %282 : vector<16x256xf32>
    %284 = arith.addf %233, %283 : vector<16x256xf32>
    %285 = vector.extract_strided_slice %9 {offsets = [39, 0], sizes = [1, 256], strides = [1, 1]} : vector<64x256xf32> to vector<1x256xf32>
    %286 = vector.extract_strided_slice %27 {offsets = [7, 0], sizes = [1, 256], strides = [1, 1]} : vector<8x256xf32> to vector<1x256xf32>
    %287 = arith.mulf %285, %286 : vector<1x256xf32>
    %288 = vector.broadcast %287 : vector<1x256xf32> to vector<16x256xf32>
    %289 = arith.mulf %242, %288 : vector<16x256xf32>
    %290 = arith.addf %239, %289 : vector<16x256xf32>
    %c0_32 = arith.constant 0 : index
    %c5 = arith.constant 5 : index
    %c0_33 = arith.constant 0 : index
    %c0_34 = arith.constant 0 : index
    %291 = vector.load %arg3[%c0_32, %c5, %c0_33, %c0_34] : memref<1x8x16x256xbf16, #tpu.memory_space<vmem>>, vector<1x1x16x256xbf16>
    %292 = vector.shape_cast %291 : vector<1x1x16x256xbf16> to vector<16x256xbf16>
    %293 = arith.extf %292 : vector<16x256xbf16> to vector<16x256xf32>
    %294 = vector.extract_strided_slice %9 {offsets = [40, 0], sizes = [1, 256], strides = [1, 1]} : vector<64x256xf32> to vector<1x256xf32>
    %295 = vector.extract_strided_slice %27 {offsets = [0, 0], sizes = [1, 256], strides = [1, 1]} : vector<8x256xf32> to vector<1x256xf32>
    %296 = arith.mulf %294, %295 : vector<1x256xf32>
    %297 = vector.broadcast %296 : vector<1x256xf32> to vector<16x256xf32>
    %298 = arith.mulf %293, %297 : vector<16x256xf32>
    %299 = arith.addf %248, %298 : vector<16x256xf32>
    %300 = vector.extract_strided_slice %9 {offsets = [41, 0], sizes = [1, 256], strides = [1, 1]} : vector<64x256xf32> to vector<1x256xf32>
    %301 = vector.extract_strided_slice %27 {offsets = [1, 0], sizes = [1, 256], strides = [1, 1]} : vector<8x256xf32> to vector<1x256xf32>
    %302 = arith.mulf %300, %301 : vector<1x256xf32>
    %303 = vector.broadcast %302 : vector<1x256xf32> to vector<16x256xf32>
    %304 = arith.mulf %293, %303 : vector<16x256xf32>
    %305 = arith.addf %254, %304 : vector<16x256xf32>
    %306 = vector.extract_strided_slice %9 {offsets = [42, 0], sizes = [1, 256], strides = [1, 1]} : vector<64x256xf32> to vector<1x256xf32>
    %307 = vector.extract_strided_slice %27 {offsets = [2, 0], sizes = [1, 256], strides = [1, 1]} : vector<8x256xf32> to vector<1x256xf32>
    %308 = arith.mulf %306, %307 : vector<1x256xf32>
    %309 = vector.broadcast %308 : vector<1x256xf32> to vector<16x256xf32>
    %310 = arith.mulf %293, %309 : vector<16x256xf32>
    %311 = arith.addf %260, %310 : vector<16x256xf32>
    %312 = vector.extract_strided_slice %9 {offsets = [43, 0], sizes = [1, 256], strides = [1, 1]} : vector<64x256xf32> to vector<1x256xf32>
    %313 = vector.extract_strided_slice %27 {offsets = [3, 0], sizes = [1, 256], strides = [1, 1]} : vector<8x256xf32> to vector<1x256xf32>
    %314 = arith.mulf %312, %313 : vector<1x256xf32>
    %315 = vector.broadcast %314 : vector<1x256xf32> to vector<16x256xf32>
    %316 = arith.mulf %293, %315 : vector<16x256xf32>
    %317 = arith.addf %266, %316 : vector<16x256xf32>
    %318 = vector.extract_strided_slice %9 {offsets = [44, 0], sizes = [1, 256], strides = [1, 1]} : vector<64x256xf32> to vector<1x256xf32>
    %319 = vector.extract_strided_slice %27 {offsets = [4, 0], sizes = [1, 256], strides = [1, 1]} : vector<8x256xf32> to vector<1x256xf32>
    %320 = arith.mulf %318, %319 : vector<1x256xf32>
    %321 = vector.broadcast %320 : vector<1x256xf32> to vector<16x256xf32>
    %322 = arith.mulf %293, %321 : vector<16x256xf32>
    %323 = arith.addf %272, %322 : vector<16x256xf32>
    %324 = vector.extract_strided_slice %9 {offsets = [45, 0], sizes = [1, 256], strides = [1, 1]} : vector<64x256xf32> to vector<1x256xf32>
    %325 = vector.extract_strided_slice %27 {offsets = [5, 0], sizes = [1, 256], strides = [1, 1]} : vector<8x256xf32> to vector<1x256xf32>
    %326 = arith.mulf %324, %325 : vector<1x256xf32>
    %327 = vector.broadcast %326 : vector<1x256xf32> to vector<16x256xf32>
    %328 = arith.mulf %293, %327 : vector<16x256xf32>
    %329 = arith.addf %278, %328 : vector<16x256xf32>
    %330 = vector.extract_strided_slice %9 {offsets = [46, 0], sizes = [1, 256], strides = [1, 1]} : vector<64x256xf32> to vector<1x256xf32>
    %331 = vector.extract_strided_slice %27 {offsets = [6, 0], sizes = [1, 256], strides = [1, 1]} : vector<8x256xf32> to vector<1x256xf32>
    %332 = arith.mulf %330, %331 : vector<1x256xf32>
    %333 = vector.broadcast %332 : vector<1x256xf32> to vector<16x256xf32>
    %334 = arith.mulf %293, %333 : vector<16x256xf32>
    %335 = arith.addf %284, %334 : vector<16x256xf32>
    %336 = vector.extract_strided_slice %9 {offsets = [47, 0], sizes = [1, 256], strides = [1, 1]} : vector<64x256xf32> to vector<1x256xf32>
    %337 = vector.extract_strided_slice %27 {offsets = [7, 0], sizes = [1, 256], strides = [1, 1]} : vector<8x256xf32> to vector<1x256xf32>
    %338 = arith.mulf %336, %337 : vector<1x256xf32>
    %339 = vector.broadcast %338 : vector<1x256xf32> to vector<16x256xf32>
    %340 = arith.mulf %293, %339 : vector<16x256xf32>
    %341 = arith.addf %290, %340 : vector<16x256xf32>
    %c0_35 = arith.constant 0 : index
    %c6 = arith.constant 6 : index
    %c0_36 = arith.constant 0 : index
    %c0_37 = arith.constant 0 : index
    %342 = vector.load %arg3[%c0_35, %c6, %c0_36, %c0_37] : memref<1x8x16x256xbf16, #tpu.memory_space<vmem>>, vector<1x1x16x256xbf16>
    %343 = vector.shape_cast %342 : vector<1x1x16x256xbf16> to vector<16x256xbf16>
    %344 = arith.extf %343 : vector<16x256xbf16> to vector<16x256xf32>
    %345 = vector.extract_strided_slice %9 {offsets = [48, 0], sizes = [1, 256], strides = [1, 1]} : vector<64x256xf32> to vector<1x256xf32>
    %346 = vector.extract_strided_slice %27 {offsets = [0, 0], sizes = [1, 256], strides = [1, 1]} : vector<8x256xf32> to vector<1x256xf32>
    %347 = arith.mulf %345, %346 : vector<1x256xf32>
    %348 = vector.broadcast %347 : vector<1x256xf32> to vector<16x256xf32>
    %349 = arith.mulf %344, %348 : vector<16x256xf32>
    %350 = arith.addf %299, %349 : vector<16x256xf32>
    %351 = vector.extract_strided_slice %9 {offsets = [49, 0], sizes = [1, 256], strides = [1, 1]} : vector<64x256xf32> to vector<1x256xf32>
    %352 = vector.extract_strided_slice %27 {offsets = [1, 0], sizes = [1, 256], strides = [1, 1]} : vector<8x256xf32> to vector<1x256xf32>
    %353 = arith.mulf %351, %352 : vector<1x256xf32>
    %354 = vector.broadcast %353 : vector<1x256xf32> to vector<16x256xf32>
    %355 = arith.mulf %344, %354 : vector<16x256xf32>
    %356 = arith.addf %305, %355 : vector<16x256xf32>
    %357 = vector.extract_strided_slice %9 {offsets = [50, 0], sizes = [1, 256], strides = [1, 1]} : vector<64x256xf32> to vector<1x256xf32>
    %358 = vector.extract_strided_slice %27 {offsets = [2, 0], sizes = [1, 256], strides = [1, 1]} : vector<8x256xf32> to vector<1x256xf32>
    %359 = arith.mulf %357, %358 : vector<1x256xf32>
    %360 = vector.broadcast %359 : vector<1x256xf32> to vector<16x256xf32>
    %361 = arith.mulf %344, %360 : vector<16x256xf32>
    %362 = arith.addf %311, %361 : vector<16x256xf32>
    %363 = vector.extract_strided_slice %9 {offsets = [51, 0], sizes = [1, 256], strides = [1, 1]} : vector<64x256xf32> to vector<1x256xf32>
    %364 = vector.extract_strided_slice %27 {offsets = [3, 0], sizes = [1, 256], strides = [1, 1]} : vector<8x256xf32> to vector<1x256xf32>
    %365 = arith.mulf %363, %364 : vector<1x256xf32>
    %366 = vector.broadcast %365 : vector<1x256xf32> to vector<16x256xf32>
    %367 = arith.mulf %344, %366 : vector<16x256xf32>
    %368 = arith.addf %317, %367 : vector<16x256xf32>
    %369 = vector.extract_strided_slice %9 {offsets = [52, 0], sizes = [1, 256], strides = [1, 1]} : vector<64x256xf32> to vector<1x256xf32>
    %370 = vector.extract_strided_slice %27 {offsets = [4, 0], sizes = [1, 256], strides = [1, 1]} : vector<8x256xf32> to vector<1x256xf32>
    %371 = arith.mulf %369, %370 : vector<1x256xf32>
    %372 = vector.broadcast %371 : vector<1x256xf32> to vector<16x256xf32>
    %373 = arith.mulf %344, %372 : vector<16x256xf32>
    %374 = arith.addf %323, %373 : vector<16x256xf32>
    %375 = vector.extract_strided_slice %9 {offsets = [53, 0], sizes = [1, 256], strides = [1, 1]} : vector<64x256xf32> to vector<1x256xf32>
    %376 = vector.extract_strided_slice %27 {offsets = [5, 0], sizes = [1, 256], strides = [1, 1]} : vector<8x256xf32> to vector<1x256xf32>
    %377 = arith.mulf %375, %376 : vector<1x256xf32>
    %378 = vector.broadcast %377 : vector<1x256xf32> to vector<16x256xf32>
    %379 = arith.mulf %344, %378 : vector<16x256xf32>
    %380 = arith.addf %329, %379 : vector<16x256xf32>
    %381 = vector.extract_strided_slice %9 {offsets = [54, 0], sizes = [1, 256], strides = [1, 1]} : vector<64x256xf32> to vector<1x256xf32>
    %382 = vector.extract_strided_slice %27 {offsets = [6, 0], sizes = [1, 256], strides = [1, 1]} : vector<8x256xf32> to vector<1x256xf32>
    %383 = arith.mulf %381, %382 : vector<1x256xf32>
    %384 = vector.broadcast %383 : vector<1x256xf32> to vector<16x256xf32>
    %385 = arith.mulf %344, %384 : vector<16x256xf32>
    %386 = arith.addf %335, %385 : vector<16x256xf32>
    %387 = vector.extract_strided_slice %9 {offsets = [55, 0], sizes = [1, 256], strides = [1, 1]} : vector<64x256xf32> to vector<1x256xf32>
    %388 = vector.extract_strided_slice %27 {offsets = [7, 0], sizes = [1, 256], strides = [1, 1]} : vector<8x256xf32> to vector<1x256xf32>
    %389 = arith.mulf %387, %388 : vector<1x256xf32>
    %390 = vector.broadcast %389 : vector<1x256xf32> to vector<16x256xf32>
    %391 = arith.mulf %344, %390 : vector<16x256xf32>
    %392 = arith.addf %341, %391 : vector<16x256xf32>
    %c0_38 = arith.constant 0 : index
    %c7 = arith.constant 7 : index
    %c0_39 = arith.constant 0 : index
    %c0_40 = arith.constant 0 : index
    %393 = vector.load %arg3[%c0_38, %c7, %c0_39, %c0_40] : memref<1x8x16x256xbf16, #tpu.memory_space<vmem>>, vector<1x1x16x256xbf16>
    %394 = vector.shape_cast %393 : vector<1x1x16x256xbf16> to vector<16x256xbf16>
    %395 = arith.extf %394 : vector<16x256xbf16> to vector<16x256xf32>
    %396 = vector.extract_strided_slice %9 {offsets = [56, 0], sizes = [1, 256], strides = [1, 1]} : vector<64x256xf32> to vector<1x256xf32>
    %397 = vector.extract_strided_slice %27 {offsets = [0, 0], sizes = [1, 256], strides = [1, 1]} : vector<8x256xf32> to vector<1x256xf32>
    %398 = arith.mulf %396, %397 : vector<1x256xf32>
    %399 = vector.broadcast %398 : vector<1x256xf32> to vector<16x256xf32>
    %400 = arith.mulf %395, %399 : vector<16x256xf32>
    %401 = arith.addf %350, %400 : vector<16x256xf32>
    %402 = vector.extract_strided_slice %9 {offsets = [57, 0], sizes = [1, 256], strides = [1, 1]} : vector<64x256xf32> to vector<1x256xf32>
    %403 = vector.extract_strided_slice %27 {offsets = [1, 0], sizes = [1, 256], strides = [1, 1]} : vector<8x256xf32> to vector<1x256xf32>
    %404 = arith.mulf %402, %403 : vector<1x256xf32>
    %405 = vector.broadcast %404 : vector<1x256xf32> to vector<16x256xf32>
    %406 = arith.mulf %395, %405 : vector<16x256xf32>
    %407 = arith.addf %356, %406 : vector<16x256xf32>
    %408 = vector.extract_strided_slice %9 {offsets = [58, 0], sizes = [1, 256], strides = [1, 1]} : vector<64x256xf32> to vector<1x256xf32>
    %409 = vector.extract_strided_slice %27 {offsets = [2, 0], sizes = [1, 256], strides = [1, 1]} : vector<8x256xf32> to vector<1x256xf32>
    %410 = arith.mulf %408, %409 : vector<1x256xf32>
    %411 = vector.broadcast %410 : vector<1x256xf32> to vector<16x256xf32>
    %412 = arith.mulf %395, %411 : vector<16x256xf32>
    %413 = arith.addf %362, %412 : vector<16x256xf32>
    %414 = vector.extract_strided_slice %9 {offsets = [59, 0], sizes = [1, 256], strides = [1, 1]} : vector<64x256xf32> to vector<1x256xf32>
    %415 = vector.extract_strided_slice %27 {offsets = [3, 0], sizes = [1, 256], strides = [1, 1]} : vector<8x256xf32> to vector<1x256xf32>
    %416 = arith.mulf %414, %415 : vector<1x256xf32>
    %417 = vector.broadcast %416 : vector<1x256xf32> to vector<16x256xf32>
    %418 = arith.mulf %395, %417 : vector<16x256xf32>
    %419 = arith.addf %368, %418 : vector<16x256xf32>
    %420 = vector.extract_strided_slice %9 {offsets = [60, 0], sizes = [1, 256], strides = [1, 1]} : vector<64x256xf32> to vector<1x256xf32>
    %421 = vector.extract_strided_slice %27 {offsets = [4, 0], sizes = [1, 256], strides = [1, 1]} : vector<8x256xf32> to vector<1x256xf32>
    %422 = arith.mulf %420, %421 : vector<1x256xf32>
    %423 = vector.broadcast %422 : vector<1x256xf32> to vector<16x256xf32>
    %424 = arith.mulf %395, %423 : vector<16x256xf32>
    %425 = arith.addf %374, %424 : vector<16x256xf32>
    %426 = vector.extract_strided_slice %9 {offsets = [61, 0], sizes = [1, 256], strides = [1, 1]} : vector<64x256xf32> to vector<1x256xf32>
    %427 = vector.extract_strided_slice %27 {offsets = [5, 0], sizes = [1, 256], strides = [1, 1]} : vector<8x256xf32> to vector<1x256xf32>
    %428 = arith.mulf %426, %427 : vector<1x256xf32>
    %429 = vector.broadcast %428 : vector<1x256xf32> to vector<16x256xf32>
    %430 = arith.mulf %395, %429 : vector<16x256xf32>
    %431 = arith.addf %380, %430 : vector<16x256xf32>
    %432 = vector.extract_strided_slice %9 {offsets = [62, 0], sizes = [1, 256], strides = [1, 1]} : vector<64x256xf32> to vector<1x256xf32>
    %433 = vector.extract_strided_slice %27 {offsets = [6, 0], sizes = [1, 256], strides = [1, 1]} : vector<8x256xf32> to vector<1x256xf32>
    %434 = arith.mulf %432, %433 : vector<1x256xf32>
    %435 = vector.broadcast %434 : vector<1x256xf32> to vector<16x256xf32>
    %436 = arith.mulf %395, %435 : vector<16x256xf32>
    %437 = arith.addf %386, %436 : vector<16x256xf32>
    %438 = vector.extract_strided_slice %9 {offsets = [63, 0], sizes = [1, 256], strides = [1, 1]} : vector<64x256xf32> to vector<1x256xf32>
    %439 = vector.extract_strided_slice %27 {offsets = [7, 0], sizes = [1, 256], strides = [1, 1]} : vector<8x256xf32> to vector<1x256xf32>
    %440 = arith.mulf %438, %439 : vector<1x256xf32>
    %441 = vector.broadcast %440 : vector<1x256xf32> to vector<16x256xf32>
    %442 = arith.mulf %395, %441 : vector<16x256xf32>
    %443 = arith.addf %392, %442 : vector<16x256xf32>
    %444 = tpu.concatenate %401, %407, %413, %419, %425, %431, %437, %443 in 0 : vector<16x256xf32>, vector<16x256xf32>, vector<16x256xf32>, vector<16x256xf32>, vector<16x256xf32>, vector<16x256xf32>, vector<16x256xf32>, vector<16x256xf32> -> vector<128x256xf32>
    %c0_41 = arith.constant 0 : index
    %c0_42 = arith.constant 0 : index
    %445 = vector.load %arg7[%c0_41, %c0_42] : memref<16x128xf32, #tpu.memory_space<vmem>>, vector<16x128xf32>
    %cst_43 = arith.constant dense<0.000000e+00> : vector<16x256xf32>
    %446 = tpu.matmul %445, %444, %cst_43 {dimension_numbers = #tpu.dot_dimension_numbers<[1], [0], [0], [1], [0, 0, 1, 1], [], []>} : vector<16x128xf32>, vector<128x256xf32>, vector<16x256xf32> -> vector<16x256xf32>
    %c0_44 = arith.constant 0 : index
    %c0_45 = arith.constant 0 : index
    %447 = vector.load %arg8[%c0_44, %c0_45] : memref<16x1xf32, #tpu.memory_space<vmem>>, vector<16x1xf32>
    %448 = vector.broadcast %447 : vector<16x1xf32> to vector<16x256xf32>
    %449 = arith.addf %446, %448 : vector<16x256xf32>
    %cst_46 = arith.constant 0.000000e+00 : f32
    %450 = vector.broadcast %cst_46 : f32 to vector<16x256xf32>
    %451 = arith.cmpf ogt, %449, %450 : vector<16x256xf32>
    %cst_47 = arith.constant 2.000000e-01 : f32
    %452 = vector.broadcast %cst_47 : f32 to vector<16x256xf32>
    %453 = arith.mulf %452, %449 : vector<16x256xf32>
    %454 = arith.select %451, %449, %453 : vector<16x256xi1>, vector<16x256xf32>
    %c0_48 = arith.constant 0 : index
    %c0_49 = arith.constant 0 : index
    %c0_50 = arith.constant 0 : index
    %455 = vector.load %arg4[%c0_48, %c0_49, %c0_50] : memref<1x16x256xf32, #tpu.memory_space<vmem>>, vector<1x16x256xf32>
    %456 = vector.shape_cast %455 : vector<1x16x256xf32> to vector<16x256xf32>
    %457 = arith.addf %454, %456 : vector<16x256xf32>
    %c0_51 = arith.constant 0 : index
    %c0_52 = arith.constant 0 : index
    %c0_53 = arith.constant 0 : index
    %458 = vector.load %arg9[%c0_51, %c0_52, %c0_53] : memref<1x16x256xf32, #tpu.memory_space<vmem>>, vector<1x16x256xf32>
    %459 = vector.shape_cast %458 : vector<1x16x256xf32> to vector<16x256xf32>
    %460 = vector.shape_cast %457 : vector<16x256xf32> to vector<1x16x256xf32>
    tpu.vector_store %arg9[%c0_51, %c0_52, %c0_53], %460 {strides = array<i32>} : memref<1x16x256xf32, #tpu.memory_space<vmem>>, vector<1x16x256xf32>,
    return
  }
  func.func @transform_0(%arg0: i32, %arg1: i32) -> (i32, i32, i32) {
    %c0_i32 = arith.constant 0 : i32
    %c0_i32_0 = arith.constant 0 : i32
    return %arg0, %c0_i32, %arg1 : i32, i32, i32
  }
  func.func @transform_1(%arg0: i32, %arg1: i32) -> (i32, i32, i32, i32) {
    %c0_i32 = arith.constant 0 : i32
    %c0_i32_0 = arith.constant 0 : i32
    %c0_i32_1 = arith.constant 0 : i32
    return %arg0, %c0_i32, %c0_i32_0, %arg1 : i32, i32, i32, i32
  }
  func.func @transform_2(%arg0: i32, %arg1: i32) -> (i32, i32, i32) {
    %c0_i32 = arith.constant 0 : i32
    %c0_i32_0 = arith.constant 0 : i32
    return %arg0, %c0_i32, %arg1 : i32, i32, i32
  }
  func.func @transform_3(%arg0: i32, %arg1: i32) -> (i32, i32) {
    %c0_i32 = arith.constant 0 : i32
    %c0_i32_0 = arith.constant 0 : i32
    %c0_i32_1 = arith.constant 0 : i32
    return %c0_i32, %c0_i32_0 : i32, i32
  }
  func.func @transform_4(%arg0: i32, %arg1: i32) -> (i32, i32) {
    %c0_i32 = arith.constant 0 : i32
    %c0_i32_0 = arith.constant 0 : i32
    %c0_i32_1 = arith.constant 0 : i32
    return %c0_i32, %c0_i32_0 : i32, i32
  }
  func.func @transform_5(%arg0: i32, %arg1: i32) -> (i32, i32) {
    %c0_i32 = arith.constant 0 : i32
    %c0_i32_0 = arith.constant 0 : i32
    %c0_i32_1 = arith.constant 0 : i32
    return %c0_i32, %c0_i32_0 : i32, i32
  }
  func.func @transform_6(%arg0: i32, %arg1: i32) -> (i32, i32) {
    %c0_i32 = arith.constant 0 : i32
    %c0_i32_0 = arith.constant 0 : i32
    %c0_i32_1 = arith.constant 0 : i32
    return %c0_i32, %c0_i32_0 : i32, i32
  }
  func.func @transform_7(%arg0: i32, %arg1: i32) -> (i32, i32, i32) {
    %c0_i32 = arith.constant 0 : i32
    %c0_i32_0 = arith.constant 0 : i32
    return %arg0, %c0_i32, %arg1 : i32, i32, i32
  }
}

</mosaic_0001>

<bundles_post_ra>
// kernel: tpu_custom_call.1
= control target key start
LH: loop header
LB: loop body
LE: loop exit
PB: predicated region body
PF: predicated region fallthrough
CT: control target
= control target key end

     0   :  { %12 = vsyncpa [#allocation3], 0  ;;  %s2643_s0 = inlined_call_operand.vmem [shape: bf16[2,24,256], index: 0, kind: input, shape index: {}]   ;;  %s2644_s1 = inlined_call_operand.hbm [shape: bf16[2,8,16,256], index: 1, kind: input, shape index: {}]   ;;  %s2645_s2 = inlined_call_operand.vmem [shape: f32[2,16,256], index: 2, kind: input, shape index: {}]   ;;  %s2646_s3 = inlined_call_operand.vmem [shape: f32[64,24], index: 3, kind: input, shape index: {}]   ;;  %s2647_s4 = inlined_call_operand.vmem [shape: f32[64,1], index: 4, kind: input, shape index: {}]   ;;  %s2648_s5 = inlined_call_operand.vmem [shape: f32[16,128], index: 5, kind: input, shape index: {}]   ;;  %s2649_s6 = inlined_call_operand.vmem [shape: f32[16,1], index: 6, kind: input, shape index: {}]   ;;  %s2650_s7 = inlined_call_operand.hbm [shape: f32[2,16,256], index: 7, kind: output, shape index: {}]  }
   0x1   :  { %14 = vsyncpa [#allocation3 + $0x1], 0 }
   0x2   :  { %15 = vsyncpa [#allocation4], 0 }
   0x3   :  { %17 = vsyncpa [#allocation4 + $0x1], 0  ;;  %s1818_s24 = smov 0   ;;  %s1820_s25 = smov 0  }
   0x4   :  { %s1822_s26 = smov 0   ;;  %s1824_s27 = smov 0  }
   0x5   :  { %s1826_s28 = smov 0   ;;  %s1828_s29 = smov 0  }
   0x6 LB: > { %2718 = sst [smem:[#allocation8_spill]] %s1767_s28  ;;  %s1533_s30 = sadd.s32 4294967295, %s1771_s29   ;;  %s1771_s29 = sphi %s1828_s29, %s23_s29   ;;  %s1767_s28 = sphi %s1826_s28, %s2914_s28   ;;  %s1763_s27 = sphi %s1824_s27, %s2913_s27   ;;  %s1759_s26 = sphi %s1822_s26, %s2917_s26   ;;  %s1755_s25 = sphi %s1820_s25, %s2916_s25   ;;  %s1751_s24 = sphi %s1818_s24, %s2915_s24  }
   0x7   : > { %s1534_s8 = sadd.s32 4294967294, %s1771_s29   ;;  %s35_s9 = sadd.s32 1, %s1767_s28 }
   0x8   : > { %s72_s10 = sadd.s32 1, %s1759_s26  ;;  %p37_p0 = scmp.ge.s32.totalorder %s35_s9, 2 }
   0x9   : > { %p79_p1 = scmp.ne.s32.totalorder %s1759_s26, %s1755_s25  ;;  %p80_p2 = scmp.eq.s32.totalorder %s1771_s29, 0 }
   0xa   : > { %p85_p3 = scmp.ne.s32.totalorder %s1755_s25, %s1751_s24  ;;  %s2919_s9 = smov (%p37_p0, %s35_s9), 0 }
   0xb   : > { %2719 = sst [smem:[#allocation9_spill]] %s2919_s9  ;;  %p1859_p4 = por %p80_p2, %p79_p1 }
   0xc   : > { %p86_p5 = scmp.eq.s32.totalorder %s1533_s30, 0  ;;  %s67_s12 = ssub.s32 %s1767_s28, %s2919_s9 }
   0xd   : > { %p223_p6 = scmp.eq.s32.totalorder %s1533_s30, 1  ;;  %p70_p7 = scmp.eq.s32.totalorder %s67_s12, 0 }
   0xe   : > { %p1865_p8 = por %p86_p5, %p85_p3  ;;  %p229_p10 = scmp.eq.s32.totalorder %s1534_s8, 1 }
   0xf   : > { %p1869_p9 = por %p223_p6, %p79_p1  ;;  %p1536_p12 = scmp.ge.s32.totalorder %s1771_s29, 2 }
  0x10   : > { %s1874_s15 = scalar_select %p70_p7, %s1759_s26, %s72_s10  }
  0x11   : > { %p1876_p11 = por %p229_p10, %p85_p3  ;;  %p1597_p13 = scmp.lt.s32.totalorder %s1771_s29, 2 }
  0x12   : > { %s274_s17 = sand.u32 1, %s1759_s26   ;;  %s1581_s19 = sshll.u32 %s1767_s28, 7 }
  0x13   : > { %s1537_s18 = sshll.u32 %s274_s17, 7  ;;  %s285_s22 = scalar_lea.hbm %s2644_s1, %s1581_s19 }
  0x14   : > { %s278_s23 = scalar_lea.vmem [#allocation2], %s1537_s18  ;;  %s286_s12 = sshll.u32 %s285_s22, 4  ;;  %s287_s12 = int_to_ptr.hbm [resolvable:$true] %s286_s12 }
  0x15   : > { %s288_s30 = sshll.u32 %s278_s23, 4  ;;  %p1590_p0 = pnand %p1597_p13, %p1859_p4  ;;  %s289_s30 = int_to_ptr.vmem [resolvable:$true] %s288_s30 }
  0x16   : > { %p1540_p1 = scmp.ge.s32.totalorder %s1771_s29, 1  ;;  %s275_s8 = scalar_lea.sflag [#allocation3], %s274_s17 }
  0x17   : > { %s1773_s10 = smov 128   ;;  %s1774_s9 = smov 8  }
  0x18   : > { %1592 = dma.hbm_to_vmem [thread:$0]  (!%p1590_p0), %s287_s12, 2048, %s289_s30, %s275_s8, %s1773_s10, %s1773_s10, %s1774_s9  }
  0x19   : > { %p309_p2 = scmp.lt.s32.totalorder %s1771_s29, 3 }
  0x1b   : > { %p310_p3 = pnand %p1540_p1, %p309_p2 }
  0x1d   : > { %313 = sbr.rel (%p310_p3) target bundleno = 567 (0x237), region = 48 }
  0x22   : > { %s1892_s28 = sand.u32 1, %s1755_s25  }
  0x23   : > { %s1541_s18 = sshll.u32 %s1892_s28, 7  ;;  %s316_s19 = scalar_lea.sflag [#allocation3], %s1892_s28 }
  0x24   : > { %s1896_s20 = scalar_lea.vmem [#allocation2], %s1541_s18 }
  0x25   : > { %1742 = dma.done.wait (%p1865_p8), %s316_s19, 2048  }
  0x26   : > { %1744 = vsyncadd (%p1865_p8), %s316_s19, 4294965248  ;;  %p370_p4 = scmp.lt.s32.totalorder %s1763_s27, 1  ;;  %v1775_v0 = vmov 0   ;;  %v408_v8 = vld [vmem:[%s2647_s4] sm:$0xff]  ;;  %v410_v11 = vld [vmem:[%s2647_s4 + $0x10] sm:$0xff]  ;;  %vm456_vm0 = vcmask 195584  }
  0x27   : > { %1652 = vset.pattern.permute.xlu0 %v1775_v0  ;;  %1653 = vset.pattern.permute.xlu1 %v1775_v0  ;;  %v400_v12 = vld [vmem:[%s2646_s3] sm:$0xff]  ;;  %v409_v13 = vld [vmem:[%s2647_s4 + $0x8] sm:$0xff]  ;;  %v411_v14 = vld [vmem:[%s2647_s4 + $0x18] sm:$0xff]  ;;  %s1542_s19 = sshll.u32 %s1892_s28, 5  ;;  %s1393_s13 = scalar_lea.sflag [#allocation4], %s1892_s28 }
  0x28   : > { %s1904_s9 = scalar_select %p370_p4, %s1763_s27, 1  ;;  %1654 = vset.pattern.permute.xlu2 %v1775_v0  ;;  %418 = vperm.xlu0 %1652, %v408_v8   ;;  %v401_v15 = vld [vmem:[%s2646_s3 + $0x8] sm:$0xff]  ;;  %v414_v16 = vld [vmem:[%s2647_s4 + $0x30] sm:$0xff]  ;;  %v415_v19 = vld [vmem:[%s2647_s4 + $0x38] sm:$0xff] }
  0x29   : > { %428 = vperm.xlu1 %1653, %v410_v11   ;;  %v402_v17 = vld [vmem:[%s2646_s3 + $0x10] sm:$0xff]  ;;  %v1311_v18 = vld [vmem:[%s2649_s6 + $0x8] sm:$0xff]  ;;  %v403_v20 = vld [vmem:[%s2646_s3 + $0x18] sm:$0xff]  ;;  %s1709_s10 = scalar_lea.hbm %s2650_s7, 64 }
  0x2a   : > { %s1584_s11 = smul.u32 24, %s1904_s9  ;;  %v412_v21 = vld [vmem:[%s2647_s4 + $0x20] sm:$0xff]  ;;  %v413_v23 = vld [vmem:[%s2647_s4 + $0x28] sm:$0xff]  ;;  %v406_v26 = vld [vmem:[%s2646_s3 + $0x30] sm:$0xff]  ;;  %s1582_s12 = sshll.u32 %s1904_s9, 5 }
  0x2b   : > { %438 = vperm.xlu2 %1654, %v412_v21   ;;  %v404_v22 = vld [vmem:[%s2646_s3 + $0x20] sm:$0xff]  ;;  %v405_v24 = vld [vmem:[%s2646_s3 + $0x28] sm:$0xff]  ;;  %v407_v27 = vld [vmem:[%s2646_s3 + $0x38] sm:$0xff]  ;;  %s2598_s18 = scalar_lea.vmem %s2645_s2, %s1582_s12  ;;  %s368_s9 = scalar_lea.vmem [#allocation5], %s1542_s19 }
  0x2c   : > { %s377_s22 = scalar_lea.vmem %s2643_s0, %s1584_s11  ;;  %v1310_v25 = vld [vmem:[%s2649_s6] sm:$0xff]  ;;  %s1583_s11 = sshll.u32 %s1763_s27, 5 }
  0x2d   : > { %v393_v1 = vld [vmem:[%s377_s22 + $0x10] sm:$0xff]  ;;  %v392_v2 = vld [vmem:[%s377_s22 + $0x8] sm:$0xff]  ;;  %v391_v3 = vld [vmem:[%s377_s22] sm:$0xff]  ;;  %s1406_s22 = scalar_lea.hbm %s2650_s7, %s1583_s11 }
  0x2e   : > { %v398_v4 = vunpack.c.l.bf16 %v393_v1  ;;  %v399_v5 = vunpack.c.h.bf16 %v393_v1  ;;  %v396_v6 = vunpack.c.l.bf16 %v392_v2  ;;  %v397_v7 = vunpack.c.h.bf16 %v392_v2  ;;  %s1409_s27 = sshll.u32 %s1406_s22, 4  ;;  %s1410_s27 = int_to_ptr.hbm [resolvable:$true] %s1409_s27 }
  0x2f   : > { %v394_v9 = vunpack.c.l.bf16 %v391_v3  ;;  %v395_v10 = vunpack.c.h.bf16 %v391_v3  ;;  %s1703_s23 = sshra.s32 %s1410_s27, 4  ;;  %s1704_s23 = int_to_ptr.hbm [resolvable:$true] %s1703_s23 }
  0x30   : > { %494 = vmatpush.msra.mxu0 %v398_v4  ;;  %535 = vmatpush.msra.mxu1 %v399_v5  ;;  %s1705_s30 = scalar_lea.hbm %s1704_s23, 32  ;;  %p1710_p8 = scmp.lt.s32.totalorder %s1704_s23, %s2650_s7 }
  0x31   : > { %423 = vperm.xlu0 %1652, %v409_v13   ;;  %433 = vperm.xlu1 %1653, %v411_v14   ;;  %p1706_p5 = scmp.ne.s32.totalorder %s1704_s23, %s1705_s30  ;;  %p1711_p10 = scmp.lt.s32.totalorder %s1709_s10, %s1705_s30 }
  0x32   : > { %495 = vmatpush.msra.mxu0 %v396_v6  ;;  %536 = vmatpush.msra.mxu1 %v397_v7 }
  0x33   : > { %443 = vperm.xlu2 %1654, %v413_v23   ;;  %p1707_p6 = pnand %p1706_p5, %p1869_p9  ;;  %p1712_p13 = por %p1711_p10, %p1710_p8 }
  0x34   : > { %496 = vmatpush.msra.mxu0 %v394_v9  ;;  %537 = vmatpush.msra.mxu1 %v395_v10 }
  0x35   : > { %1546 = vmatmul.msk.f32.vlgmr.msra.gmra.mxu0 %vm456_vm0, %v400_v12  ;;  %1554 = vmatmul.msk.f32.vlgmr.msra.gmra.mxu1 %vm456_vm0, %v400_v12  ;;  %p1708_p7 = pneg %p1707_p6 }
  0x37   : > { %p1713_p0 = pnand %p1712_p13, %p1708_p7 }
  0x39   : > { %448 = vperm.xlu0 %1652, %v414_v16   ;;  %453 = vperm.xlu1 %1653, %v415_v19  }
  0x3b   : > { %1314 = vperm.xlu2 %1654, %v1310_v25  }
  0x3d   : > { %1547 = vmatmul.msk.f32.gmra.mxu0 %vm456_vm0, %v401_v15  ;;  %1555 = vmatmul.msk.f32.gmra.mxu1 %vm456_vm0, %v401_v15 }
  0x41   : > { %1319 = vperm.xlu0 %1652, %v1311_v18  }
  0x45   : > { %1548 = vmatmul.msk.f32.gmra.mxu0 %vm456_vm0, %v402_v17  ;;  %1556 = vmatmul.msk.f32.gmra.mxu1 %vm456_vm0, %v402_v17 }
  0x4d   : > { %1549 = vmatmul.msk.f32.gmra.mxu0 %vm456_vm0, %v403_v20  ;;  %1557 = vmatmul.msk.f32.gmra.mxu1 %vm456_vm0, %v403_v20 }
  0x55   : > { %1550 = vmatmul.msk.f32.gmra.mxu0 %vm456_vm0, %v404_v22  ;;  %1558 = vmatmul.msk.f32.gmra.mxu1 %vm456_vm0, %v404_v22 }
  0x5d   : > { %1551 = vmatmul.msk.f32.gmra.mxu0 %vm456_vm0, %v405_v24  ;;  %1559 = vmatmul.msk.f32.gmra.mxu1 %vm456_vm0, %v405_v24 }
  0x65   : > { %1552 = vmatmul.msk.f32.gmra.mxu0 %vm456_vm0, %v406_v26  ;;  %1560 = vmatmul.msk.f32.gmra.mxu1 %vm456_vm0, %v406_v26 }
  0x6d   : > { %1553 = vmatmul.msk.f32.gmra.mxu0 %vm456_vm0, %v407_v27  ;;  %1561 = vmatmul.msk.f32.gmra.mxu1 %vm456_vm0, %v407_v27 }
  0x85   : > { %v439_v41 = vpop.permute.xlu2 %438 }
  0x8d   : > { %v444_v61 = vpop.permute.xlu2 %443 }
  0x9a   : > { %v419_v36 = vpop.permute.xlu0 %418 }
  0x9b   : > { %v429_v37 = vpop.permute.xlu1 %428 }
  0xa3   : > { %v424_v40 = vpop.permute.xlu0 %423  ;;  %v434_v50 = vpop.permute.xlu1 %433 }
  0xab   : > { %v449_v8 = vpop.permute.xlu0 %448  ;;  %v454_v19 = vpop.permute.xlu1 %453 }
  0xb2   : > { %v498_v28 = vpop.f32.mrf.mxu0  ;;  %v539_v29 = vpop.f32.mrf.mxu1 }
  0xb3   : > { %v1984_v46 = vadd.f32 %v498_v28, %v419_v36  ;;  %v1986_v47 = vadd.f32 %v539_v29, %v419_v36  ;;  %v1565_v36 = vld [vmem:[%s1896_s20 + $0x28] sm:$0xff] }
  0xb5   : > { %v563_v55 = vmax.f32 %v1984_v46, 0.0  ;;  %v2659_v56 = vmax.f32 %v1986_v47, 0.0 }
  0xba   : > { %v501_v30 = vpop.f32.mrf.mxu0  ;;  %v542_v31 = vpop.f32.mrf.mxu1 }
  0xbb   : > { %v1980_v42 = vadd.f32 %v501_v30, %v424_v40  ;;  %v1982_v43 = vadd.f32 %v542_v31, %v424_v40 }
  0xbd   : > { %v565_v51 = vmax.f32 %v1980_v42, 0.0  ;;  %v2658_v52 = vmax.f32 %v1982_v43, 0.0 }
  0xbf   : > { %v579_v62 = vadd.f32 %v565_v51, %v563_v55  ;;  %v580_v63 = vadd.f32 %v2658_v52, %v2659_v56 }
  0xc2   : > { %v504_v32 = vpop.f32.mrf.mxu0  ;;  %v545_v33 = vpop.f32.mrf.mxu1 }
  0xc3   : > { %v1988_v48 = vadd.f32 %v504_v32, %v429_v37  ;;  %v1990_v49 = vadd.f32 %v545_v33, %v429_v37  ;;  %v1567_v37 = vld [vmem:[%s1896_s20 + $0x38] sm:$0xff] }
  0xc5   : > { %v567_v57 = vmax.f32 %v1988_v48, 0.0  ;;  %v2657_v58 = vmax.f32 %v1990_v49, 0.0 }
  0xc7   : > { %v581_v6 = vadd.f32 %v579_v62, %v567_v57  ;;  %v582_v7 = vadd.f32 %v580_v63, %v2657_v58  ;;  %v2070_v62 = vunpack.c.l.bf16 %v1565_v36  ;;  %v2072_v63 = vunpack.c.l.bf16 %v1567_v37 }
  0xc9   : > { %2725 = vst [vmem:[#allocation11_spill] sm:$0xff] %v2070_v62 }
  0xca   : > { %v507_v34 = vpop.f32.mrf.mxu0  ;;  %v548_v35 = vpop.f32.mrf.mxu1  ;;  %2726 = vst [vmem:[#allocation12_spill] sm:$0xff] %v2072_v63 }
  0xcb   : > { %v1994_v53 = vadd.f32 %v507_v34, %v434_v50  ;;  %v1996_v54 = vadd.f32 %v548_v35, %v434_v50  ;;  %v598_v34 = vld [vmem:[%s1896_s20 + $0x8] sm:$0xff]  ;;  %v1563_v35 = vld [vmem:[%s1896_s20 + $0x18] sm:$0xff] }
  0xcc   : > { %v2066_v50 = vunpack.c.l.bf16 %v598_v34 }
  0xcd   : > { %v569_v2 = vmax.f32 %v1994_v53, 0.0  ;;  %v2656_v3 = vmax.f32 %v1996_v54, 0.0 }
  0xcf   : > { %v583_v13 = vadd.f32 %v581_v6, %v569_v2  ;;  %v584_v14 = vadd.f32 %v582_v7, %v2656_v3  ;;  %v597_v6 = vld [vmem:[%s1896_s20] sm:$0xff]  ;;  %v1562_v7 = vld [vmem:[%s1896_s20 + $0x10] sm:$0xff] }
  0xd2   : > { %v510_v38 = vpop.f32.mrf.mxu0  ;;  %v551_v39 = vpop.f32.mrf.mxu1 }
  0xd3   : > { %v2002_v59 = vadd.f32 %v510_v38, %v439_v41  ;;  %v2004_v60 = vadd.f32 %v551_v39, %v439_v41  ;;  %v1569_v38 = vld [vmem:[%s1896_s20 + $0x48] sm:$0xff]  ;;  %v1571_v39 = vld [vmem:[%s1896_s20 + $0x58] sm:$0xff] }
  0xd5   : > { %v571_v9 = vmax.f32 %v2002_v59, 0.0  ;;  %v2655_v10 = vmax.f32 %v2004_v60, 0.0 }
  0xd7   : > { %v585_v17 = vadd.f32 %v583_v13, %v571_v9  ;;  %v586_v18 = vadd.f32 %v584_v14, %v2655_v10  ;;  %v2084_v14 = vunpack.c.h.bf16 %v598_v34 }
  0xd9   : > { %2731 = vst [vmem:[#allocation17_spill] sm:$0xff] %v2084_v14 }
  0xda   : > { %v513_v44 = vpop.f32.mrf.mxu0  ;;  %v554_v45 = vpop.f32.mrf.mxu1 }
  0xdb   : > { %v2016_v4 = vadd.f32 %v513_v44, %v444_v61  ;;  %v2018_v5 = vadd.f32 %v554_v45, %v444_v61  ;;  %v1573_v44 = vld [vmem:[%s1896_s20 + $0x68] sm:$0xff]  ;;  %v1575_v45 = vld [vmem:[%s1896_s20 + $0x78] sm:$0xff]  ;;  %v2068_v61 = vunpack.c.l.bf16 %v1563_v35 }
  0xdc   : > { %v2082_v13 = vunpack.c.l.bf16 %v1575_v45  ;;  %v2104_v34 = vunpack.c.h.bf16 %v1575_v45 }
  0xdd   : > { %v573_v15 = vmax.f32 %v2016_v4, 0.0  ;;  %v2654_v16 = vmax.f32 %v2018_v5, 0.0  ;;  %2724 = vst [vmem:[#allocation10_spill] sm:$0xff] %v2068_v61 }
  0xde   : > { %2730 = vst [vmem:[#allocation16_spill] sm:$0xff] %v2082_v13 }
  0xdf   : > { %v587_v24 = vadd.f32 %v585_v17, %v573_v15  ;;  %v588_v25 = vadd.f32 %v586_v18, %v2654_v16  ;;  %v2086_v17 = vunpack.c.h.bf16 %v1563_v35  ;;  %v1564_v18 = vld [vmem:[%s1896_s20 + $0x20] sm:$0xff]  ;;  %2738 = vst [vmem:[#allocation24_spill] sm:$0xff] %v2104_v34  ;;  %v2106_v35 = vunpack.c.l.bf16 %v597_v6 }
  0xe0   : > { %v2124_v16 = vunpack.c.h.bf16 %v1562_v7  ;;  %v2126_v10 = vunpack.c.h.bf16 %v1564_v18 }
  0xe1   : > { %2732 = vst [vmem:[#allocation18_spill] sm:$0xff] %v2086_v17 }
  0xe2   : > { %v516_v0 = vpop.f32.mrf.mxu0  ;;  %v557_v1 = vpop.f32.mrf.mxu1 }
  0xe3   : > { %v2026_v11 = vadd.f32 %v516_v0, %v449_v8  ;;  %v2028_v12 = vadd.f32 %v557_v1, %v449_v8  ;;  %v2074_v0 = vunpack.c.l.bf16 %v1569_v38  ;;  %v2076_v1 = vunpack.c.l.bf16 %v1571_v39 }
  0xe4   : > { %v2080_v8 = vunpack.c.l.bf16 %v1573_v44 }
  0xe5   : > { %v575_v20 = vmax.f32 %v2026_v11, 0.0  ;;  %v2653_v21 = vmax.f32 %v2028_v12, 0.0  ;;  %2727 = vst [vmem:[#allocation13_spill] sm:$0xff] %v2074_v0 }
  0xe6   : > { %2728 = vst [vmem:[#allocation14_spill] sm:$0xff] %v2076_v1 }
  0xe7   : > { %v589_v28 = vadd.f32 %v587_v24, %v575_v20  ;;  %v590_v29 = vadd.f32 %v588_v25, %v2653_v21  ;;  %2729 = vst [vmem:[#allocation15_spill] sm:$0xff] %v2080_v8  ;;  %v2093_v24 = vunpack.c.h.bf16 %v1567_v37  ;;  %v2095_v25 = vunpack.c.h.bf16 %v1569_v38 }
  0xe9   : > { %2734 = vst [vmem:[#allocation20_spill] sm:$0xff] %v2093_v24 }
  0xea   : > { %v519_v22 = vpop.f32.mrf.mxu0  ;;  %v560_v23 = vpop.f32.mrf.mxu1  ;;  %2735 = vst [vmem:[#allocation21_spill] sm:$0xff] %v2095_v25 }
  0xeb   : > { %v2046_v26 = vadd.f32 %v519_v22, %v454_v19  ;;  %v2048_v27 = vadd.f32 %v560_v23, %v454_v19  ;;  %v1566_v19 = vld [vmem:[%s1896_s20 + $0x30] sm:$0xff]  ;;  %v1568_v22 = vld [vmem:[%s1896_s20 + $0x40] sm:$0xff]  ;;  %v2091_v23 = vunpack.c.h.bf16 %v1565_v36 }
  0xec   : > { %v2112_v36 = vunpack.c.l.bf16 %v1566_v19  ;;  %v2114_v37 = vunpack.c.l.bf16 %v1568_v22  ;;  %v2128_v3 = vunpack.c.h.bf16 %v1566_v19  ;;  %v2130_v58 = vunpack.c.h.bf16 %v1568_v22 }
  0xed   : > { %v577_v30 = vmax.f32 %v2046_v26, 0.0  ;;  %v2660_v31 = vmax.f32 %v2048_v27, 0.0  ;;  %2733 = vst [vmem:[#allocation19_spill] sm:$0xff] %v2091_v23  ;;  %v1570_v26 = vld [vmem:[%s1896_s20 + $0x50] sm:$0xff]  ;;  %v2744_v4 = vmax.f32 %v2048_v27, 0.0  ;;  %v2746_v27 = vmax.f32 %v1986_v47, 0.0 }
  0xee   : > { %v2116_v38 = vunpack.c.l.bf16 %v1570_v26  ;;  %v2756_v47 = vmax.f32 %v2018_v5, 0.0 }
  0xef   : > { %v591_v32 = vadd.f32 %v589_v28, %v577_v30  ;;  %v592_v33 = vadd.f32 %v590_v29, %v2660_v31  ;;  %v1572_v28 = vld [vmem:[%s1896_s20 + $0x60] sm:$0xff]  ;;  %v1574_v29 = vld [vmem:[%s1896_s20 + $0x70] sm:$0xff]  ;;  %s1407_s20 = sshll.u32 %s368_s9, 4  ;;  %s1408_s20 = int_to_ptr.vmem [resolvable:$true] %s1407_s20 }
  0xf0   : > { %v2118_v21 = vunpack.c.l.bf16 %v1572_v28 }
  0xf1   : > { %v593_v40 = vadd.f32 1e-06, %v591_v32  ;;  %v594_v41 = vadd.f32 1e-06, %v592_v33  ;;  %v2100_v32 = vunpack.c.h.bf16 %v1571_v39  ;;  %v2102_v33 = vunpack.c.h.bf16 %v1573_v44 }
  0xf2   : > { %v2120_v39 = vunpack.c.l.bf16 %v1574_v29  ;;  %v2122_v44 = vunpack.c.h.bf16 %v597_v6 }
  0xf3   : > { %1655 = vrcp.f32 %v593_v40  ;;  %2736 = vst [vmem:[#allocation22_spill] sm:$0xff] %v2100_v32  ;;  %v2108_v40 = vunpack.c.l.bf16 %v1562_v7  ;;  %v2144_v7 = vunpack.c.h.bf16 %v1570_v26 }
  0xf4   : > { %1657 = vrcp.f32 %v594_v41  ;;  %2737 = vst [vmem:[#allocation23_spill] sm:$0xff] %v2102_v33  ;;  %v2110_v41 = vunpack.c.l.bf16 %v1564_v18 }
  0xf9   : > { %v1656_v45 = vpop.eup %1655 }
  0xfa   : > { %v2134_v52 = vmul.f32 %v1656_v45, %v563_v55  ;;  %v2138_v56 = vmul.f32 %v1656_v45, %v565_v51  ;;  %v2142_v6 = vmul.f32 %v1656_v45, %v567_v57  ;;  %v1658_v18 = vpop.eup %1657  ;;  %v2146_v31 = vmul.f32 %v1656_v45, %v577_v30 }
  0xfb   : > { %v2150_v19 = vmul.f32 %v1656_v45, %v569_v2  ;;  %v2154_v46 = vmul.f32 %v1656_v45, %v571_v9  ;;  %v2158_v42 = vmul.f32 %v1656_v45, %v573_v15  ;;  %v2165_v57 = vmul.f32 %v1656_v45, %v575_v20 }
  0xfc   : > { %2739 = vst [vmem:[#allocation25_spill] sm:$0xff] %v2146_v31  ;;  %v675_v48 = vperm.slane %v2134_v52, 7  ;;  %v764_v51 = vperm.slane %v2138_v56, 7  ;;  %v853_v55 = vperm.slane %v2142_v6, 7  ;;  %v2169_v2 = vunpack.c.h.bf16 %v1572_v28 }
  0xfd   : > { %2740 = vst [vmem:[#allocation26_spill] sm:$0xff] %v2158_v42  ;;  %v942_v53 = vperm.slane %v2150_v19, 7  ;;  %v1031_v59 = vperm.slane %v2154_v46, 7  ;;  %v2171_v9 = vunpack.c.h.bf16 %v1574_v29  ;;  %v2175_v15 = vmul.f32 %v1658_v18, %v2744_v4 }
  0xfe   : > { %2741 = vst [vmem:[#allocation27_spill] sm:$0xff] %v2165_v57  ;;  %v679_v30 = vmul.f32 %v675_v48, %v2066_v50  ;;  %v768_v22 = vmul.f32 %v764_v51, %v2068_v61  ;;  %v1120_v11 = vperm.slane %v2158_v42, 7  ;;  %v857_v20 = vmul.f32 %v853_v55, %v2070_v62 }
  0xff   : > { %2742 = vst [vmem:[#allocation28_spill] sm:$0xff] %v2169_v2  ;;  %v946_v26 = vmul.f32 %v942_v53, %v2072_v63  ;;  %v1209_v45 = vperm.slane %v2165_v57, 7  ;;  %v1298_v28 = vperm.slane %v2146_v31, 7  ;;  %v2187_v4 = vmul.f32 %v1658_v18, %v2746_v27 }
 0x100   : > { %2743 = vst [vmem:[#allocation29_spill] sm:$0xff] %v2171_v9  ;;  %v772_v29 = vadd.f32 %v768_v22, %v679_v30  ;;  %v1035_v9 = vmul.f32 %v1031_v59, %v2074_v0  ;;  %v2748_v2 = vmax.f32 %v1982_v43, 0.0  ;;  %v2750_v42 = vmax.f32 %v1990_v49, 0.0 }
 0x101   : > { %2745 = vst [vmem:[#allocation30_spill] sm:$0xff] %v2175_v15  ;;  %v2752_v63 = vmax.f32 %v1996_v54, 0.0  ;;  %v2754_v30 = vmax.f32 %v2004_v60, 0.0  ;;  %v2207_v27 = vmul.f32 %v1658_v18, %v2756_v47  ;;  %v676_v43 = vperm.slane %v2187_v4, 7 }
 0x102   : > { %2747 = vst [vmem:[#allocation31_spill] sm:$0xff] %v2187_v4  ;;  %v2191_v61 = vmul.f32 %v1658_v18, %v2748_v2  ;;  %v2195_v62 = vmul.f32 %v1658_v18, %v2750_v42  ;;  %v861_v31 = vadd.f32 %v857_v20, %v772_v29  ;;  %v2758_v49 = vmax.f32 %v2028_v12, 0.0 }
 0x103   : > { %v2199_v57 = vmul.f32 %v1658_v18, %v2752_v63  ;;  %v2203_v22 = vmul.f32 %v1658_v18, %v2754_v30  ;;  %2757 = vst [vmem:[#allocation36_spill] sm:$0xff] %v2207_v27  ;;  %v1121_v30 = vperm.slane %v2207_v27, 7  ;;  %v680_v47 = vmul.f32 %v676_v43, %v2084_v14 }
 0x104   : > { %2749 = vst [vmem:[#allocation32_spill] sm:$0xff] %v2191_v61  ;;  %v765_v2 = vperm.slane %v2191_v61, 7  ;;  %v2213_v42 = vmul.f32 %v1658_v18, %v2758_v49  ;;  %v854_v54 = vperm.slane %v2195_v62, 7  ;;  %v950_v5 = vadd.f32 %v946_v26, %v861_v31 }
 0x105   : > { %2751 = vst [vmem:[#allocation33_spill] sm:$0xff] %v2195_v62  ;;  %v943_v63 = vperm.slane %v2199_v57, 7  ;;  %v1032_v60 = vperm.slane %v2203_v22, 7  ;;  %v1124_v61 = vmul.f32 %v1120_v11, %v2076_v1  ;;  %v1213_v12 = vmul.f32 %v1209_v45, %v2080_v8 }
 0x106   : > { %2753 = vst [vmem:[#allocation34_spill] sm:$0xff] %v2199_v57  ;;  %v769_v20 = vmul.f32 %v765_v2, %v2086_v17  ;;  %v1210_v29 = vperm.slane %v2213_v42, 7  ;;  %v1302_v18 = vmul.f32 %v1298_v28, %v2082_v13  ;;  %v858_v49 = vmul.f32 %v854_v54, %v2091_v23 }
 0x107   : > { %2755 = vst [vmem:[#allocation35_spill] sm:$0xff] %v2203_v22  ;;  %v1039_v57 = vadd.f32 %v1035_v9, %v950_v5  ;;  %v947_v22 = vmul.f32 %v943_v63, %v2093_v24  ;;  %v1299_v31 = vperm.slane %v2175_v15, 7  ;;  %v1036_v26 = vmul.f32 %v1032_v60, %v2095_v25 }
 0x108   : > { %2759 = vst [vmem:[#allocation37_spill] sm:$0xff] %v2213_v42  ;;  %v773_v62 = vadd.f32 %v769_v20, %v680_v47  ;;  %v1125_v27 = vmul.f32 %v1121_v30, %v2100_v32  ;;  %v677_v42 = vmul.f32 %v675_v48, %v2106_v35  ;;  %v766_v1 = vmul.f32 %v764_v51, %v2108_v40 }
 0x109   : > { %v1128_v17 = vadd.f32 %v1124_v61, %v1039_v57  ;;  %v1214_v13 = vmul.f32 %v1210_v29, %v2102_v33  ;;  %v855_v23 = vmul.f32 %v853_v55, %v2110_v41  ;;  %v1303_v9 = vmul.f32 %v1299_v31, %v2104_v34 }
 0x10a   : > { %v862_v8 = vadd.f32 %v858_v49, %v773_v62  ;;  %v770_v5 = vadd.f32 %v766_v1, %v677_v42  ;;  %v944_v47 = vmul.f32 %v942_v53, %v2112_v36  ;;  %v1033_v20 = vmul.f32 %v1031_v59, %v2114_v37 }
 0x10b   : > { %v1217_v25 = vadd.f32 %v1213_v12, %v1128_v17  ;;  %v678_v32 = vmul.f32 %v676_v43, %v2122_v44  ;;  %v767_v48 = vmul.f32 %v765_v2, %v2124_v16  ;;  %v1122_v61 = vmul.f32 %v1120_v11, %v2116_v38 }
 0x10c   : > { %v951_v15 = vadd.f32 %v947_v22, %v862_v8  ;;  %v859_v51 = vadd.f32 %v855_v23, %v770_v5  ;;  %v1211_v62 = vmul.f32 %v1209_v45, %v2118_v21  ;;  %v1300_v55 = vmul.f32 %v1298_v28, %v2120_v39 }
 0x10d   : > { %v1306_v57 = vadd.f32 %v1302_v18, %v1217_v25  ;;  %v771_v1 = vadd.f32 %v767_v48, %v678_v32  ;;  %v856_v53 = vmul.f32 %v854_v54, %v2126_v10  ;;  %v945_v17 = vmul.f32 %v943_v63, %v2128_v3  ;;  %v2760_v63 = vld [vmem:[#allocation10_spill] sm:$0xff] }
 0x10e   : > { %v1040_v49 = vadd.f32 %v1036_v26, %v951_v15  ;;  %v948_v42 = vadd.f32 %v944_v47, %v859_v51  ;;  %v1034_v8 = vmul.f32 %v1032_v60, %v2130_v58  ;;  %v665_v59 = vperm.slane %v2134_v52, 6  ;;  %v2762_v26 = vld [vmem:[#allocation29_spill] sm:$0xff]  ;;  %v2763_v47 = vld [vmem:[#allocation11_spill] sm:$0xff] }
 0x10f   : > { %1322 = vmatpush.msra.mxu2 %v1306_v57  ;;  %v860_v22 = vadd.f32 %v856_v53, %v771_v1  ;;  %v754_v11 = vperm.slane %v2138_v56, 6  ;;  %v843_v45 = vperm.slane %v2142_v6, 6  ;;  %v932_v32 = vperm.slane %v2150_v19, 6 }
 0x110   : > { %v1129_v23 = vadd.f32 %v1125_v27, %v1040_v49  ;;  %v1037_v28 = vadd.f32 %v1033_v20, %v948_v42  ;;  %v669_v25 = vmul.f32 %v665_v59, %v2066_v50  ;;  %v1021_v15 = vperm.slane %v2154_v46, 6  ;;  %v2761_v27 = vld [vmem:[#allocation28_spill] sm:$0xff]  ;;  %v2765_v42 = vld [vmem:[#allocation26_spill] sm:$0xff] }
 0x111   : > { %v949_v2 = vadd.f32 %v945_v17, %v860_v22  ;;  %v1123_v54 = vmul.f32 %v1121_v30, %v2144_v7  ;;  %v758_v60 = vmul.f32 %v754_v11, %v2760_v63  ;;  %v1212_v18 = vmul.f32 %v1210_v29, %v2761_v27  ;;  %v2764_v49 = vld [vmem:[#allocation12_spill] sm:$0xff]  ;;  %v2766_v29 = vld [vmem:[#allocation27_spill] sm:$0xff] }
 0x112   : > { %v1218_v43 = vadd.f32 %v1214_v13, %v1129_v23  ;;  %v1126_v12 = vadd.f32 %v1122_v61, %v1037_v28  ;;  %v1301_v5 = vmul.f32 %v1299_v31, %v2762_v26  ;;  %v847_v48 = vmul.f32 %v843_v45, %v2763_v47  ;;  %v2767_v31 = vld [vmem:[#allocation32_spill] sm:$0xff] }
 0x113   : > { %v1038_v51 = vadd.f32 %v1034_v8, %v949_v2  ;;  %v762_v57 = vadd.f32 %v758_v60, %v669_v25  ;;  %v936_v1 = vmul.f32 %v932_v32, %v2764_v49  ;;  %v1025_v13 = vmul.f32 %v1021_v15, %v2074_v0  ;;  %v2771_v0 = vld [vmem:[#allocation34_spill] sm:$0xff]  ;;  %v2776_v49 = vld [vmem:[#allocation19_spill] sm:$0xff] }
 0x114   : > { %v1307_v20 = vadd.f32 %v1303_v9, %v1218_v43  ;;  %v1215_v53 = vadd.f32 %v1211_v62, %v1126_v12  ;;  %v1110_v17 = vperm.slane %v2765_v42, 6  ;;  %v666_v30 = vperm.slane %v2187_v4, 6  ;;  %v2768_v9 = vld [vmem:[#allocation25_spill] sm:$0xff]  ;;  %v2770_v12 = vld [vmem:[#allocation18_spill] sm:$0xff] }
 0x115   : > { %v1127_v61 = vadd.f32 %v1123_v54, %v1038_v51  ;;  %v851_v23 = vadd.f32 %v847_v48, %v762_v57  ;;  %v1199_v22 = vperm.slane %v2766_v29, 6  ;;  %v755_v28 = vperm.slane %v2767_v31, 6  ;;  %v2769_v43 = vld [vmem:[#allocation33_spill] sm:$0xff]  ;;  %v2772_v54 = vld [vmem:[#allocation14_spill] sm:$0xff]  ;;  %v2774_v57 = vld [vmem:[#allocation36_spill] sm:$0xff] }
 0x116   : > { %1345 = vmatpush.msra.mxu3 %v1307_v20  ;;  %v1304_v47 = vadd.f32 %v1300_v55, %v1215_v53  ;;  %v1288_v8 = vperm.slane %v2768_v9, 6  ;;  %v670_v25 = vmul.f32 %v666_v30, %v2084_v14  ;;  %v844_v62 = vperm.slane %v2769_v43, 6  ;;  %v2773_v20 = vld [vmem:[#allocation35_spill] sm:$0xff]  ;;  %v2775_v55 = vld [vmem:[#allocation37_spill] sm:$0xff] }
 0x117   : > { %v1216_v2 = vadd.f32 %v1212_v18, %v1127_v61  ;;  %v940_v60 = vadd.f32 %v936_v1, %v851_v23  ;;  %v759_v42 = vmul.f32 %v755_v28, %v2770_v12  ;;  %v933_v4 = vperm.slane %v2771_v0, 6  ;;  %v2777_v18 = vld [vmem:[#allocation15_spill] sm:$0xff]  ;;  %v2778_v61 = vld [vmem:[#allocation16_spill] sm:$0xff] }
 0x118   : > { %1323 = vmatpush.msra.mxu2 %v1304_v47  ;;  %v1114_v48 = vmul.f32 %v1110_v17, %v2772_v54  ;;  %v1022_v51 = vperm.slane %v2773_v20, 6  ;;  %v1111_v29 = vperm.slane %v2774_v57, 6  ;;  %v1200_v53 = vperm.slane %v2775_v55, 6  ;;  %v2779_v47 = vld [vmem:[#allocation30_spill] sm:$0xff] }
 0x119   : > { %v1305_v9 = vadd.f32 %v1301_v5, %v1216_v2  ;;  %v1029_v31 = vadd.f32 %v1025_v13, %v940_v60  ;;  %v763_v14 = vadd.f32 %v759_v42, %v670_v25  ;;  %v848_v43 = vmul.f32 %v844_v62, %v2776_v49  ;;  %v2780_v5 = vld [vmem:[#allocation21_spill] sm:$0xff]  ;;  %v2781_v42 = vld [vmem:[#allocation22_spill] sm:$0xff] }
 0x11a   : > { %v1203_v1 = vmul.f32 %v1199_v22, %v2777_v18  ;;  %v1292_v23 = vmul.f32 %v1288_v8, %v2778_v61  ;;  %v937_v0 = vmul.f32 %v933_v4, %v2093_v24  ;;  %v1289_v12 = vperm.slane %v2779_v47, 6 }
 0x11b   : > { %1346 = vmatpush.msra.mxu3 %v1305_v9  ;;  %v1118_v54 = vadd.f32 %v1114_v48, %v1029_v31  ;;  %v852_v20 = vadd.f32 %v848_v43, %v763_v14  ;;  %v667_v57 = vmul.f32 %v665_v59, %v2106_v35  ;;  %v756_v55 = vmul.f32 %v754_v11, %v2108_v40 }
 0x11c   : > { %v1026_v13 = vmul.f32 %v1022_v51, %v2780_v5  ;;  %v1115_v25 = vmul.f32 %v1111_v29, %v2781_v42  ;;  %v1204_v2 = vmul.f32 %v1200_v53, %v2102_v33  ;;  %v1293_v60 = vmul.f32 %v1289_v12, %v2104_v34 }
 0x11d   : > { %v1207_v61 = vadd.f32 %v1203_v1, %v1118_v54  ;;  %v941_v18 = vadd.f32 %v937_v0, %v852_v20  ;;  %v760_v24 = vadd.f32 %v756_v55, %v667_v57  ;;  %v845_v47 = vmul.f32 %v843_v45, %v2110_v41 }
 0x11e   : > { %v934_v31 = vmul.f32 %v932_v32, %v2112_v36  ;;  %v1023_v14 = vmul.f32 %v1021_v15, %v2114_v37  ;;  %v668_v59 = vmul.f32 %v666_v30, %v2122_v44  ;;  %v757_v11 = vmul.f32 %v755_v28, %v2124_v16 }
 0x11f   : > { %v1296_v9 = vadd.f32 %v1292_v23, %v1207_v61  ;;  %v1030_v43 = vadd.f32 %v1026_v13, %v941_v18  ;;  %v849_v48 = vadd.f32 %v845_v47, %v760_v24  ;;  %v1112_v33 = vmul.f32 %v1110_v17, %v2116_v38 }
 0x120   : > { %v1201_v34 = vmul.f32 %v1199_v22, %v2118_v21  ;;  %v1290_v0 = vmul.f32 %v1288_v8, %v2120_v39  ;;  %v761_v54 = vadd.f32 %v757_v11, %v668_v59  ;;  %v846_v45 = vmul.f32 %v844_v62, %v2126_v10  ;;  %v2783_v59 = vld [vmem:[#allocation12_spill] sm:$0xff] }
 0x121   : > { %1324 = vmatpush.msra.mxu2 %v1296_v9  ;;  %v1119_v32 = vadd.f32 %v1115_v25, %v1030_v43  ;;  %v938_v20 = vadd.f32 %v934_v31, %v849_v48  ;;  %v935_v15 = vmul.f32 %v933_v4, %v2128_v3  ;;  %v1024_v30 = vmul.f32 %v1022_v51, %v2130_v58  ;;  %v2782_v31 = vld [vmem:[#allocation11_spill] sm:$0xff]  ;;  %v2784_v43 = vld [vmem:[#allocation13_spill] sm:$0xff] }
 0x122   : > { %v850_v28 = vadd.f32 %v846_v45, %v761_v54  ;;  %v655_v57 = vperm.slane %v2134_v52, 5  ;;  %v744_v24 = vperm.slane %v2138_v56, 5  ;;  %v833_v17 = vperm.slane %v2142_v6, 5  ;;  %v2785_v48 = vld [vmem:[#allocation31_spill] sm:$0xff]  ;;  %v2786_v45 = vld [vmem:[#allocation32_spill] sm:$0xff] }
 0x123   : > { %v1208_v22 = vadd.f32 %v1204_v2, %v1119_v32  ;;  %v1027_v55 = vadd.f32 %v1023_v14, %v938_v20  ;;  %v922_v8 = vperm.slane %v2150_v19, 5  ;;  %v1011_v62 = vperm.slane %v2154_v46, 5  ;;  %v2787_v20 = vld [vmem:[#allocation26_spill] sm:$0xff] }
 0x124   : > { %v939_v18 = vadd.f32 %v935_v15, %v850_v28  ;;  %v1113_v1 = vmul.f32 %v1111_v29, %v2144_v7  ;;  %v659_v4 = vmul.f32 %v655_v57, %v2066_v50  ;;  %v748_v51 = vmul.f32 %v744_v24, %v2760_v63  ;;  %v2788_v15 = vld [vmem:[#allocation27_spill] sm:$0xff]  ;;  %v2789_v28 = vld [vmem:[#allocation25_spill] sm:$0xff] }
 0x125   : > { %v1297_v61 = vadd.f32 %v1293_v60, %v1208_v22  ;;  %v1116_v23 = vadd.f32 %v1112_v33, %v1027_v55  ;;  %v1202_v47 = vmul.f32 %v1200_v53, %v2761_v27  ;;  %v1291_v13 = vmul.f32 %v1289_v12, %v2762_v26  ;;  %v2790_v55 = vld [vmem:[#allocation17_spill] sm:$0xff] }
 0x126   : > { %v1028_v25 = vadd.f32 %v1024_v30, %v939_v18  ;;  %v752_v2 = vadd.f32 %v748_v51, %v659_v4  ;;  %v837_v14 = vmul.f32 %v833_v17, %v2782_v31  ;;  %v926_v11 = vmul.f32 %v922_v8, %v2783_v59  ;;  %v2791_v4 = vld [vmem:[#allocation18_spill] sm:$0xff] }
 0x127   : > { %1347 = vmatpush.msra.mxu3 %v1297_v61  ;;  %v1205_v9 = vadd.f32 %v1201_v34, %v1116_v23  ;;  %v1015_v29 = vmul.f32 %v1011_v62, %v2784_v43  ;;  %v656_v54 = vperm.slane %v2785_v48, 5  ;;  %v745_v32 = vperm.slane %v2786_v45, 5  ;;  %v2792_v23 = vld [vmem:[#allocation33_spill] sm:$0xff]  ;;  %v2793_v48 = vld [vmem:[#allocation34_spill] sm:$0xff] }
 0x128   : > { %v1117_v60 = vadd.f32 %v1113_v1, %v1028_v25  ;;  %v841_v33 = vadd.f32 %v837_v14, %v752_v2  ;;  %v1100_v53 = vperm.slane %v2787_v20, 5  ;;  %v1189_v12 = vperm.slane %v2788_v15, 5  ;;  %v2794_v25 = vld [vmem:[#allocation35_spill] sm:$0xff]  ;;  %v2795_v14 = vld [vmem:[#allocation36_spill] sm:$0xff]  ;;  %v2796_v15 = vld [vmem:[#allocation37_spill] sm:$0xff] }
 0x129   : > { %v1294_v30 = vadd.f32 %v1290_v0, %v1205_v9  ;;  %v1278_v22 = vperm.slane %v2789_v28, 5  ;;  %v660_v18 = vmul.f32 %v656_v54, %v2790_v55  ;;  %v749_v51 = vmul.f32 %v745_v32, %v2791_v4  ;;  %v2797_v45 = vld [vmem:[#allocation14_spill] sm:$0xff] }
 0x12a   : > { %v1206_v34 = vadd.f32 %v1202_v47, %v1117_v60  ;;  %v930_v61 = vadd.f32 %v926_v11, %v841_v33  ;;  %v834_v43 = vperm.slane %v2792_v23, 5  ;;  %v923_v59 = vperm.slane %v2793_v48, 5  ;;  %v2798_v47 = vld [vmem:[#allocation15_spill] sm:$0xff]  ;;  %v2799_v60 = vld [vmem:[#allocation16_spill] sm:$0xff] }
 0x12b   : > { %1325 = vmatpush.msra.mxu2 %v1294_v30  ;;  %v753_v1 = vadd.f32 %v749_v51, %v660_v18  ;;  %v1012_v2 = vperm.slane %v2794_v25, 5  ;;  %v1101_v20 = vperm.slane %v2795_v14, 5  ;;  %v1190_v0 = vperm.slane %v2796_v15, 5  ;;  %v2800_v23 = vld [vmem:[#allocation20_spill] sm:$0xff]  ;;  %v2801_v30 = vld [vmem:[#allocation30_spill] sm:$0xff] }
 0x12c   : > { %v1295_v9 = vadd.f32 %v1291_v13, %v1206_v34  ;;  %v1019_v28 = vadd.f32 %v1015_v29, %v930_v61  ;;  %v1104_v55 = vmul.f32 %v1100_v53, %v2797_v45  ;;  %v838_v4 = vmul.f32 %v834_v43, %v2776_v49  ;;  %v2802_v61 = vld [vmem:[#allocation23_spill] sm:$0xff] }
 0x12d   : > { %v1193_v11 = vmul.f32 %v1189_v12, %v2798_v47  ;;  %v1282_v33 = vmul.f32 %v1278_v22, %v2799_v60  ;;  %v927_v48 = vmul.f32 %v923_v59, %v2800_v23  ;;  %v1279_v18 = vperm.slane %v2801_v30, 5  ;;  %v2803_v47 = vld [vmem:[#allocation24_spill] sm:$0xff] }
 0x12e   : > { %1348 = vmatpush.msra.mxu3 %v1295_v9  ;;  %v1108_v51 = vadd.f32 %v1104_v55, %v1019_v28  ;;  %v842_v25 = vadd.f32 %v838_v4, %v753_v1  ;;  %v657_v14 = vmul.f32 %v655_v57, %v2106_v35  ;;  %v746_v13 = vmul.f32 %v744_v24, %v2108_v40 }
 0x12f   : > { %v1016_v29 = vmul.f32 %v1012_v2, %v2780_v5  ;;  %v1105_v34 = vmul.f32 %v1101_v20, %v2781_v42  ;;  %v1194_v49 = vmul.f32 %v1190_v0, %v2802_v61  ;;  %v1283_v45 = vmul.f32 %v1279_v18, %v2803_v47 }
 0x130   : > { %v1197_v60 = vadd.f32 %v1193_v11, %v1108_v51  ;;  %v931_v15 = vadd.f32 %v927_v48, %v842_v25  ;;  %v750_v23 = vadd.f32 %v746_v13, %v657_v14  ;;  %v835_v30 = vmul.f32 %v833_v17, %v2110_v41 }
 0x131   : > { %v924_v28 = vmul.f32 %v922_v8, %v2112_v36  ;;  %v1013_v55 = vmul.f32 %v1011_v62, %v2114_v37  ;;  %v658_v57 = vmul.f32 %v656_v54, %v2122_v44  ;;  %v747_v24 = vmul.f32 %v745_v32, %v2124_v16 }
 0x132   : > { %v1286_v4 = vadd.f32 %v1282_v33, %v1197_v60  ;;  %v1020_v1 = vadd.f32 %v1016_v29, %v931_v15  ;;  %v839_v9 = vadd.f32 %v835_v30, %v750_v23  ;;  %v1102_v61 = vmul.f32 %v1100_v53, %v2116_v38 }
 0x133   : > { %v1191_v47 = vmul.f32 %v1189_v12, %v2118_v21  ;;  %v1280_v48 = vmul.f32 %v1278_v22, %v2120_v39  ;;  %v751_v25 = vadd.f32 %v747_v24, %v658_v57  ;;  %v836_v17 = vmul.f32 %v834_v43, %v2126_v10 }
 0x134   : > { %1326 = vmatpush.msra.mxu2 %v1286_v4  ;;  %v1109_v8 = vadd.f32 %v1105_v34, %v1020_v1  ;;  %v928_v14 = vadd.f32 %v924_v28, %v839_v9  ;;  %v925_v62 = vmul.f32 %v923_v59, %v2128_v3  ;;  %v1014_v54 = vmul.f32 %v1012_v2, %v2130_v58  ;;  %v2805_v4 = vld [vmem:[#allocation13_spill] sm:$0xff]  ;;  %v2806_v1 = vld [vmem:[#allocation31_spill] sm:$0xff] }
 0x135   : > { %v840_v32 = vadd.f32 %v836_v17, %v751_v25  ;;  %v645_v15 = vperm.slane %v2134_v52, 4  ;;  %v734_v23 = vperm.slane %v2138_v56, 4  ;;  %v823_v53 = vperm.slane %v2142_v6, 4  ;;  %v2807_v25 = vld [vmem:[#allocation32_spill] sm:$0xff] }
 0x136   : > { %v1198_v12 = vadd.f32 %v1194_v49, %v1109_v8  ;;  %v1017_v11 = vadd.f32 %v1013_v55, %v928_v14  ;;  %v912_v22 = vperm.slane %v2150_v19, 4  ;;  %v1001_v43 = vperm.slane %v2154_v46, 4  ;;  %v2804_v55 = vld [vmem:[#allocation12_spill] sm:$0xff]  ;;  %v2808_v8 = vld [vmem:[#allocation26_spill] sm:$0xff]  ;;  %v2809_v14 = vld [vmem:[#allocation27_spill] sm:$0xff] }
 0x137   : > { %v929_v60 = vadd.f32 %v925_v62, %v840_v32  ;;  %v1103_v33 = vmul.f32 %v1101_v20, %v2144_v7  ;;  %v649_v59 = vmul.f32 %v645_v15, %v2066_v50  ;;  %v738_v2 = vmul.f32 %v734_v23, %v2760_v63 }
 0x138   : > { %v1287_v30 = vadd.f32 %v1283_v45, %v1198_v12  ;;  %v1106_v51 = vadd.f32 %v1102_v61, %v1017_v11  ;;  %v1192_v13 = vmul.f32 %v1190_v0, %v2761_v27  ;;  %v1281_v29 = vmul.f32 %v1279_v18, %v2762_v26  ;;  %v2811_v12 = vld [vmem:[#allocation17_spill] sm:$0xff] }
 0x139   : > { %v1018_v34 = vadd.f32 %v1014_v54, %v929_v60  ;;  %v742_v49 = vadd.f32 %v738_v2, %v649_v59  ;;  %v827_v28 = vmul.f32 %v823_v53, %v2782_v31  ;;  %v916_v57 = vmul.f32 %v912_v22, %v2804_v55  ;;  %v2810_v54 = vld [vmem:[#allocation25_spill] sm:$0xff]  ;;  %v2812_v60 = vld [vmem:[#allocation18_spill] sm:$0xff]  ;;  %v2819_v55 = vld [vmem:[#allocation19_spill] sm:$0xff] }
 0x13a   : > { %1349 = vmatpush.msra.mxu3 %v1287_v30  ;;  %v1195_v24 = vadd.f32 %v1191_v47, %v1106_v51  ;;  %v1005_v20 = vmul.f32 %v1001_v43, %v2805_v4  ;;  %v646_v9 = vperm.slane %v2806_v1, 4  ;;  %v735_v17 = vperm.slane %v2807_v25, 4  ;;  %v2813_v30 = vld [vmem:[#allocation33_spill] sm:$0xff]  ;;  %v2814_v1 = vld [vmem:[#allocation34_spill] sm:$0xff] }
 0x13b   : > { %v1107_v45 = vadd.f32 %v1103_v33, %v1018_v34  ;;  %v831_v61 = vadd.f32 %v827_v28, %v742_v49  ;;  %v1090_v0 = vperm.slane %v2808_v8, 4  ;;  %v1179_v18 = vperm.slane %v2809_v14, 4  ;;  %v2815_v34 = vld [vmem:[#allocation35_spill] sm:$0xff]  ;;  %v2816_v28 = vld [vmem:[#allocation36_spill] sm:$0xff]  ;;  %v2817_v14 = vld [vmem:[#allocation37_spill] sm:$0xff] }
 0x13c   : > { %v1284_v62 = vadd.f32 %v1280_v48, %v1195_v24  ;;  %v1268_v32 = vperm.slane %v2810_v54, 4  ;;  %v650_v11 = vmul.f32 %v646_v9, %v2811_v12  ;;  %v739_v59 = vmul.f32 %v735_v17, %v2812_v60  ;;  %v2818_v25 = vld [vmem:[#allocation14_spill] sm:$0xff] }
 0x13d   : > { %v1196_v47 = vadd.f32 %v1192_v13, %v1107_v45  ;;  %v920_v2 = vadd.f32 %v916_v57, %v831_v61  ;;  %v824_v51 = vperm.slane %v2813_v30, 4  ;;  %v913_v4 = vperm.slane %v2814_v1, 4  ;;  %v2820_v13 = vld [vmem:[#allocation15_spill] sm:$0xff]  ;;  %v2821_v45 = vld [vmem:[#allocation16_spill] sm:$0xff] }
 0x13e   : > { %1327 = vmatpush.msra.mxu2 %v1284_v62  ;;  %v743_v33 = vadd.f32 %v739_v59, %v650_v11  ;;  %v1002_v49 = vperm.slane %v2815_v34, 4  ;;  %v1091_v8 = vperm.slane %v2816_v28, 4  ;;  %v1180_v48 = vperm.slane %v2817_v14, 4  ;;  %v2822_v30 = vld [vmem:[#allocation20_spill] sm:$0xff]  ;;  %v2823_v62 = vld [vmem:[#allocation30_spill] sm:$0xff] }
 0x13f   : > { %v1285_v24 = vadd.f32 %v1281_v29, %v1196_v47  ;;  %v1009_v54 = vadd.f32 %v1005_v20, %v920_v2  ;;  %v1094_v12 = vmul.f32 %v1090_v0, %v2818_v25  ;;  %v828_v60 = vmul.f32 %v824_v51, %v2819_v55  ;;  %v2824_v2 = vld [vmem:[#allocation23_spill] sm:$0xff] }
 0x140   : > { %v1183_v57 = vmul.f32 %v1179_v18, %v2820_v13  ;;  %v1272_v61 = vmul.f32 %v1268_v32, %v2821_v45  ;;  %v917_v1 = vmul.f32 %v913_v4, %v2822_v30  ;;  %v1269_v11 = vperm.slane %v2823_v62, 4  ;;  %v2825_v13 = vld [vmem:[#allocation24_spill] sm:$0xff] }
 0x141   : > { %1350 = vmatpush.msra.mxu3 %v1285_v24  ;;  %v1098_v59 = vadd.f32 %v1094_v12, %v1009_v54  ;;  %v832_v34 = vadd.f32 %v828_v60, %v743_v33  ;;  %v647_v28 = vmul.f32 %v645_v15, %v2106_v35  ;;  %v736_v29 = vmul.f32 %v734_v23, %v2108_v40 }
 0x142   : > { %v1006_v20 = vmul.f32 %v1002_v49, %v2780_v5  ;;  %v1095_v47 = vmul.f32 %v1091_v8, %v2781_v42  ;;  %v1184_v55 = vmul.f32 %v1180_v48, %v2824_v2  ;;  %v1273_v25 = vmul.f32 %v1269_v11, %v2825_v13 }
 0x143   : > { %v1187_v45 = vadd.f32 %v1183_v57, %v1098_v59  ;;  %v921_v14 = vadd.f32 %v917_v1, %v832_v34  ;;  %v740_v30 = vadd.f32 %v736_v29, %v647_v28  ;;  %v825_v62 = vmul.f32 %v823_v53, %v2110_v41 }
 0x144   : > { %v914_v54 = vmul.f32 %v912_v22, %v2112_v36  ;;  %v1003_v12 = vmul.f32 %v1001_v43, %v2114_v37  ;;  %v648_v15 = vmul.f32 %v646_v9, %v2122_v44  ;;  %v737_v23 = vmul.f32 %v735_v17, %v2124_v16 }
 0x145   : > { %v1276_v60 = vadd.f32 %v1272_v61, %v1187_v45  ;;  %v1010_v33 = vadd.f32 %v1006_v20, %v921_v14  ;;  %v829_v24 = vadd.f32 %v825_v62, %v740_v30  ;;  %v1092_v2 = vmul.f32 %v1090_v0, %v2116_v38 }
 0x146   : > { %v1181_v13 = vmul.f32 %v1179_v18, %v2118_v21  ;;  %v1270_v1 = vmul.f32 %v1268_v32, %v2120_v39  ;;  %v741_v34 = vadd.f32 %v737_v23, %v648_v15  ;;  %v826_v53 = vmul.f32 %v824_v51, %v2126_v10 }
 0x147   : > { %1328 = vmatpush.msra.mxu2 %v1276_v60  ;;  %v1099_v22 = vadd.f32 %v1095_v47, %v1010_v33  ;;  %v918_v28 = vadd.f32 %v914_v54, %v829_v24  ;;  %v915_v43 = vmul.f32 %v913_v4, %v2128_v3  ;;  %v1004_v9 = vmul.f32 %v1002_v49, %v2130_v58  ;;  %v2827_v60 = vld [vmem:[#allocation13_spill] sm:$0xff]  ;;  %v2828_v33 = vld [vmem:[#allocation31_spill] sm:$0xff] }
 0x148   : > { %v830_v17 = vadd.f32 %v826_v53, %v741_v34  ;;  %v635_v14 = vperm.slane %v2134_v52, 3  ;;  %v724_v30 = vperm.slane %v2138_v56, 3  ;;  %v813_v0 = vperm.slane %v2142_v6, 3  ;;  %v2829_v34 = vld [vmem:[#allocation32_spill] sm:$0xff] }
 0x149   : > { %v1188_v18 = vadd.f32 %v1184_v55, %v1099_v22  ;;  %v1007_v57 = vadd.f32 %v1003_v12, %v918_v28  ;;  %v902_v32 = vperm.slane %v2150_v19, 3  ;;  %v991_v51 = vperm.slane %v2154_v46, 3  ;;  %v2826_v12 = vld [vmem:[#allocation12_spill] sm:$0xff]  ;;  %v2830_v22 = vld [vmem:[#allocation26_spill] sm:$0xff]  ;;  %v2831_v28 = vld [vmem:[#allocation27_spill] sm:$0xff] }
 0x14a   : > { %v919_v45 = vadd.f32 %v915_v43, %v830_v17  ;;  %v1093_v61 = vmul.f32 %v1091_v8, %v2144_v7  ;;  %v639_v4 = vmul.f32 %v635_v14, %v2066_v50  ;;  %v728_v49 = vmul.f32 %v724_v30, %v2760_v63 }
 0x14b   : > { %v1277_v62 = vadd.f32 %v1273_v25, %v1188_v18  ;;  %v1096_v59 = vadd.f32 %v1092_v2, %v1007_v57  ;;  %v1182_v29 = vmul.f32 %v1180_v48, %v2761_v27  ;;  %v1271_v20 = vmul.f32 %v1269_v11, %v2762_v26  ;;  %v2833_v18 = vld [vmem:[#allocation17_spill] sm:$0xff] }
 0x14c   : > { %v1008_v47 = vadd.f32 %v1004_v9, %v919_v45  ;;  %v732_v55 = vadd.f32 %v728_v49, %v639_v4  ;;  %v817_v54 = vmul.f32 %v813_v0, %v2782_v31  ;;  %v906_v15 = vmul.f32 %v902_v32, %v2826_v12  ;;  %v2832_v9 = vld [vmem:[#allocation25_spill] sm:$0xff]  ;;  %v2834_v45 = vld [vmem:[#allocation18_spill] sm:$0xff]  ;;  %v2841_v12 = vld [vmem:[#allocation19_spill] sm:$0xff] }
 0x14d   : > { %1351 = vmatpush.msra.mxu3 %v1277_v62  ;;  %v1185_v23 = vadd.f32 %v1181_v13, %v1096_v59  ;;  %v995_v8 = vmul.f32 %v991_v51, %v2827_v60  ;;  %v636_v24 = vperm.slane %v2828_v33, 3  ;;  %v725_v53 = vperm.slane %v2829_v34, 3  ;;  %v2835_v62 = vld [vmem:[#allocation33_spill] sm:$0xff]  ;;  %v2836_v33 = vld [vmem:[#allocation34_spill] sm:$0xff] }
 0x14e   : > { %v1097_v25 = vadd.f32 %v1093_v61, %v1008_v47  ;;  %v821_v2 = vadd.f32 %v817_v54, %v732_v55  ;;  %v1080_v48 = vperm.slane %v2830_v22, 3  ;;  %v1169_v11 = vperm.slane %v2831_v28, 3  ;;  %v2837_v47 = vld [vmem:[#allocation35_spill] sm:$0xff]  ;;  %v2838_v54 = vld [vmem:[#allocation36_spill] sm:$0xff]  ;;  %v2839_v28 = vld [vmem:[#allocation37_spill] sm:$0xff] }
 0x14f   : > { %v1274_v43 = vadd.f32 %v1270_v1, %v1185_v23  ;;  %v1258_v17 = vperm.slane %v2832_v9, 3  ;;  %v640_v57 = vmul.f32 %v636_v24, %v2833_v18  ;;  %v729_v4 = vmul.f32 %v725_v53, %v2834_v45  ;;  %v2840_v34 = vld [vmem:[#allocation14_spill] sm:$0xff] }
 0x150   : > { %v1186_v13 = vadd.f32 %v1182_v29, %v1097_v25  ;;  %v910_v49 = vadd.f32 %v906_v15, %v821_v2  ;;  %v814_v59 = vperm.slane %v2835_v62, 3  ;;  %v903_v60 = vperm.slane %v2836_v33, 3  ;;  %v2842_v29 = vld [vmem:[#allocation15_spill] sm:$0xff]  ;;  %v2843_v25 = vld [vmem:[#allocation16_spill] sm:$0xff] }
 0x151   : > { %1329 = vmatpush.msra.mxu2 %v1274_v43  ;;  %v733_v61 = vadd.f32 %v729_v4, %v640_v57  ;;  %v992_v55 = vperm.slane %v2837_v47, 3  ;;  %v1081_v22 = vperm.slane %v2838_v54, 3  ;;  %v1170_v1 = vperm.slane %v2839_v28, 3  ;;  %v2844_v62 = vld [vmem:[#allocation20_spill] sm:$0xff]  ;;  %v2845_v43 = vld [vmem:[#allocation30_spill] sm:$0xff] }
 0x152   : > { %v1275_v23 = vadd.f32 %v1271_v20, %v1186_v13  ;;  %v999_v9 = vadd.f32 %v995_v8, %v910_v49  ;;  %v1084_v18 = vmul.f32 %v1080_v48, %v2840_v34  ;;  %v818_v45 = vmul.f32 %v814_v59, %v2841_v12  ;;  %v2846_v49 = vld [vmem:[#allocation23_spill] sm:$0xff] }
 0x153   : > { %v1173_v15 = vmul.f32 %v1169_v11, %v2842_v29  ;;  %v1262_v2 = vmul.f32 %v1258_v17, %v2843_v25  ;;  %v907_v33 = vmul.f32 %v903_v60, %v2844_v62  ;;  %v1259_v57 = vperm.slane %v2845_v43, 3  ;;  %v2847_v29 = vld [vmem:[#allocation24_spill] sm:$0xff] }
 0x154   : > { %1352 = vmatpush.msra.mxu3 %v1275_v23  ;;  %v1088_v4 = vadd.f32 %v1084_v18, %v999_v9  ;;  %v822_v47 = vadd.f32 %v818_v45, %v733_v61  ;;  %v637_v54 = vmul.f32 %v635_v14, %v2106_v35  ;;  %v726_v20 = vmul.f32 %v724_v30, %v2108_v40 }
 0x155   : > { %v996_v8 = vmul.f32 %v992_v55, %v2780_v5  ;;  %v1085_v13 = vmul.f32 %v1081_v22, %v2781_v42  ;;  %v1174_v12 = vmul.f32 %v1170_v1, %v2846_v49  ;;  %v1263_v34 = vmul.f32 %v1259_v57, %v2847_v29 }
 0x156   : > { %v1177_v25 = vadd.f32 %v1173_v15, %v1088_v4  ;;  %v911_v28 = vadd.f32 %v907_v33, %v822_v47  ;;  %v730_v62 = vadd.f32 %v726_v20, %v637_v54  ;;  %v815_v43 = vmul.f32 %v813_v0, %v2110_v41 }
 0x157   : > { %v904_v9 = vmul.f32 %v902_v32, %v2112_v36  ;;  %v993_v18 = vmul.f32 %v991_v51, %v2114_v37  ;;  %v638_v14 = vmul.f32 %v636_v24, %v2122_v44  ;;  %v727_v30 = vmul.f32 %v725_v53, %v2124_v16 }
 0x158   : > { %v1266_v45 = vadd.f32 %v1262_v2, %v1177_v25  ;;  %v1000_v61 = vadd.f32 %v996_v8, %v911_v28  ;;  %v819_v23 = vadd.f32 %v815_v43, %v730_v62  ;;  %v1082_v49 = vmul.f32 %v1080_v48, %v2116_v38 }
 0x159   : > { %v1171_v29 = vmul.f32 %v1169_v11, %v2118_v21  ;;  %v1260_v33 = vmul.f32 %v1258_v17, %v2120_v39  ;;  %v731_v47 = vadd.f32 %v727_v30, %v638_v14  ;;  %v816_v0 = vmul.f32 %v814_v59, %v2126_v10 }
 0x15a   : > { %1330 = vmatpush.msra.mxu2 %v1266_v45  ;;  %v1089_v32 = vadd.f32 %v1085_v13, %v1000_v61  ;;  %v908_v54 = vadd.f32 %v904_v9, %v819_v23  ;;  %v905_v51 = vmul.f32 %v903_v60, %v2128_v3  ;;  %v994_v24 = vmul.f32 %v992_v55, %v2130_v58  ;;  %v2849_v45 = vld [vmem:[#allocation13_spill] sm:$0xff]  ;;  %v2850_v61 = vld [vmem:[#allocation31_spill] sm:$0xff] }
 0x15b   : > { %v820_v53 = vadd.f32 %v816_v0, %v731_v47  ;;  %v625_v28 = vperm.slane %v2134_v52, 2  ;;  %v714_v62 = vperm.slane %v2138_v56, 2  ;;  %v803_v48 = vperm.slane %v2142_v6, 2  ;;  %v2851_v47 = vld [vmem:[#allocation32_spill] sm:$0xff] }
 0x15c   : > { %v1178_v11 = vadd.f32 %v1174_v12, %v1089_v32  ;;  %v997_v15 = vadd.f32 %v993_v18, %v908_v54  ;;  %v892_v17 = vperm.slane %v2150_v19, 2  ;;  %v981_v59 = vperm.slane %v2154_v46, 2  ;;  %v2848_v18 = vld [vmem:[#allocation12_spill] sm:$0xff]  ;;  %v2852_v32 = vld [vmem:[#allocation26_spill] sm:$0xff]  ;;  %v2853_v54 = vld [vmem:[#allocation27_spill] sm:$0xff] }
 0x15d   : > { %v909_v25 = vadd.f32 %v905_v51, %v820_v53  ;;  %v1083_v2 = vmul.f32 %v1081_v22, %v2144_v7  ;;  %v629_v60 = vmul.f32 %v625_v28, %v2066_v50  ;;  %v718_v55 = vmul.f32 %v714_v62, %v2760_v63 }
 0x15e   : > { %v1267_v43 = vadd.f32 %v1263_v34, %v1178_v11  ;;  %v1086_v4 = vadd.f32 %v1082_v49, %v997_v15  ;;  %v1172_v20 = vmul.f32 %v1170_v1, %v2761_v27  ;;  %v1261_v8 = vmul.f32 %v1259_v57, %v2762_v26  ;;  %v2855_v11 = vld [vmem:[#allocation17_spill] sm:$0xff] }
 0x15f   : > { %v998_v13 = vadd.f32 %v994_v24, %v909_v25  ;;  %v722_v12 = vadd.f32 %v718_v55, %v629_v60  ;;  %v807_v9 = vmul.f32 %v803_v48, %v2782_v31  ;;  %v896_v14 = vmul.f32 %v892_v17, %v2848_v18  ;;  %v2854_v24 = vld [vmem:[#allocation25_spill] sm:$0xff]  ;;  %v2856_v25 = vld [vmem:[#allocation18_spill] sm:$0xff]  ;;  %v2863_v18 = vld [vmem:[#allocation19_spill] sm:$0xff] }
 0x160   : > { %1353 = vmatpush.msra.mxu3 %v1267_v43  ;;  %v1175_v30 = vadd.f32 %v1171_v29, %v1086_v4  ;;  %v985_v22 = vmul.f32 %v981_v59, %v2849_v45  ;;  %v626_v23 = vperm.slane %v2850_v61, 2  ;;  %v715_v0 = vperm.slane %v2851_v47, 2  ;;  %v2857_v43 = vld [vmem:[#allocation33_spill] sm:$0xff]  ;;  %v2858_v61 = vld [vmem:[#allocation34_spill] sm:$0xff] }
 0x161   : > { %v1087_v34 = vadd.f32 %v1083_v2, %v998_v13  ;;  %v811_v49 = vadd.f32 %v807_v9, %v722_v12  ;;  %v1070_v1 = vperm.slane %v2852_v32, 2  ;;  %v1159_v57 = vperm.slane %v2853_v54, 2  ;;  %v2859_v13 = vld [vmem:[#allocation35_spill] sm:$0xff]  ;;  %v2860_v9 = vld [vmem:[#allocation36_spill] sm:$0xff]  ;;  %v2861_v54 = vld [vmem:[#allocation37_spill] sm:$0xff] }
 0x162   : > { %v1264_v51 = vadd.f32 %v1260_v33, %v1175_v30  ;;  %v1248_v53 = vperm.slane %v2854_v24, 2  ;;  %v630_v15 = vmul.f32 %v626_v23, %v2855_v11  ;;  %v719_v60 = vmul.f32 %v715_v0, %v2856_v25  ;;  %v2862_v47 = vld [vmem:[#allocation14_spill] sm:$0xff] }
 0x163   : > { %v1176_v29 = vadd.f32 %v1172_v20, %v1087_v34  ;;  %v900_v55 = vadd.f32 %v896_v14, %v811_v49  ;;  %v804_v4 = vperm.slane %v2857_v43, 2  ;;  %v893_v45 = vperm.slane %v2858_v61, 2  ;;  %v2864_v20 = vld [vmem:[#allocation15_spill] sm:$0xff]  ;;  %v2865_v34 = vld [vmem:[#allocation16_spill] sm:$0xff] }
 0x164   : > { %1331 = vmatpush.msra.mxu2 %v1264_v51  ;;  %v723_v2 = vadd.f32 %v719_v60, %v630_v15  ;;  %v982_v12 = vperm.slane %v2859_v13, 2  ;;  %v1071_v32 = vperm.slane %v2860_v9, 2  ;;  %v1160_v33 = vperm.slane %v2861_v54, 2  ;;  %v2866_v43 = vld [vmem:[#allocation20_spill] sm:$0xff]  ;;  %v2867_v51 = vld [vmem:[#allocation30_spill] sm:$0xff] }
 0x165   : > { %v1265_v30 = vadd.f32 %v1261_v8, %v1176_v29  ;;  %v989_v24 = vadd.f32 %v985_v22, %v900_v55  ;;  %v1074_v11 = vmul.f32 %v1070_v1, %v2862_v47  ;;  %v808_v25 = vmul.f32 %v804_v4, %v2863_v18  ;;  %v2868_v55 = vld [vmem:[#allocation23_spill] sm:$0xff] }
 0x166   : > { %v1163_v14 = vmul.f32 %v1159_v57, %v2864_v20  ;;  %v1252_v49 = vmul.f32 %v1248_v53, %v2865_v34  ;;  %v897_v61 = vmul.f32 %v893_v45, %v2866_v43  ;;  %v1249_v15 = vperm.slane %v2867_v51, 2  ;;  %v2869_v20 = vld [vmem:[#allocation24_spill] sm:$0xff] }
 0x167   : > { %1354 = vmatpush.msra.mxu3 %v1265_v30  ;;  %v1078_v60 = vadd.f32 %v1074_v11, %v989_v24  ;;  %v812_v13 = vadd.f32 %v808_v25, %v723_v2  ;;  %v627_v9 = vmul.f32 %v625_v28, %v2106_v35  ;;  %v716_v8 = vmul.f32 %v714_v62, %v2108_v40 }
 0x168   : > { %v986_v22 = vmul.f32 %v982_v12, %v2780_v5  ;;  %v1075_v29 = vmul.f32 %v1071_v32, %v2781_v42  ;;  %v1164_v18 = vmul.f32 %v1160_v33, %v2868_v55  ;;  %v1253_v47 = vmul.f32 %v1249_v15, %v2869_v20 }
 0x169   : > { %v1167_v34 = vadd.f32 %v1163_v14, %v1078_v60  ;;  %v901_v54 = vadd.f32 %v897_v61, %v812_v13  ;;  %v720_v43 = vadd.f32 %v716_v8, %v627_v9  ;;  %v805_v51 = vmul.f32 %v803_v48, %v2110_v41 }
 0x16a   : > { %v894_v24 = vmul.f32 %v892_v17, %v2112_v36  ;;  %v983_v11 = vmul.f32 %v981_v59, %v2114_v37  ;;  %v628_v28 = vmul.f32 %v626_v23, %v2122_v44  ;;  %v717_v62 = vmul.f32 %v715_v0, %v2124_v16 }
 0x16b   : > { %v1256_v25 = vadd.f32 %v1252_v49, %v1167_v34  ;;  %v990_v2 = vadd.f32 %v986_v22, %v901_v54  ;;  %v809_v30 = vadd.f32 %v805_v51, %v720_v43  ;;  %v1072_v55 = vmul.f32 %v1070_v1, %v2116_v38 }
 0x16c   : > { %v1161_v20 = vmul.f32 %v1159_v57, %v2118_v21  ;;  %v1250_v61 = vmul.f32 %v1248_v53, %v2120_v39  ;;  %v721_v13 = vadd.f32 %v717_v62, %v628_v28  ;;  %v806_v48 = vmul.f32 %v804_v4, %v2126_v10 }
 0x16d   : > { %1332 = vmatpush.msra.mxu2 %v1256_v25  ;;  %v1079_v17 = vadd.f32 %v1075_v29, %v990_v2  ;;  %v898_v9 = vadd.f32 %v894_v24, %v809_v30  ;;  %v895_v59 = vmul.f32 %v893_v45, %v2128_v3  ;;  %v984_v23 = vmul.f32 %v982_v12, %v2130_v58  ;;  %v2871_v25 = vld [vmem:[#allocation13_spill] sm:$0xff]  ;;  %v2872_v2 = vld [vmem:[#allocation31_spill] sm:$0xff] }
 0x16e   : > { %v810_v0 = vadd.f32 %v806_v48, %v721_v13  ;;  %v615_v54 = vperm.slane %v2134_v52, 1  ;;  %v704_v43 = vperm.slane %v2138_v56, 1  ;;  %v793_v1 = vperm.slane %v2142_v6, 1  ;;  %v2873_v13 = vld [vmem:[#allocation32_spill] sm:$0xff] }
 0x16f   : > { %v1168_v57 = vadd.f32 %v1164_v18, %v1079_v17  ;;  %v987_v14 = vadd.f32 %v983_v11, %v898_v9  ;;  %v882_v53 = vperm.slane %v2150_v19, 1  ;;  %v971_v4 = vperm.slane %v2154_v46, 1  ;;  %v2870_v11 = vld [vmem:[#allocation12_spill] sm:$0xff]  ;;  %v2874_v17 = vld [vmem:[#allocation26_spill] sm:$0xff]  ;;  %v2875_v9 = vld [vmem:[#allocation27_spill] sm:$0xff] }
 0x170   : > { %v899_v34 = vadd.f32 %v895_v59, %v810_v0  ;;  %v1073_v49 = vmul.f32 %v1071_v32, %v2144_v7  ;;  %v619_v45 = vmul.f32 %v615_v54, %v2066_v50  ;;  %v708_v12 = vmul.f32 %v704_v43, %v2760_v63 }
 0x171   : > { %v1257_v51 = vadd.f32 %v1253_v47, %v1168_v57  ;;  %v1076_v60 = vadd.f32 %v1072_v55, %v987_v14  ;;  %v1162_v8 = vmul.f32 %v1160_v33, %v2761_v27  ;;  %v1251_v22 = vmul.f32 %v1249_v15, %v2762_v26  ;;  %v2877_v57 = vld [vmem:[#allocation17_spill] sm:$0xff] }
 0x172   : > { %v988_v29 = vadd.f32 %v984_v23, %v899_v34  ;;  %v712_v18 = vadd.f32 %v708_v12, %v619_v45  ;;  %v797_v24 = vmul.f32 %v793_v1, %v2782_v31  ;;  %v886_v28 = vmul.f32 %v882_v53, %v2870_v11  ;;  %v2876_v23 = vld [vmem:[#allocation25_spill] sm:$0xff]  ;;  %v2878_v34 = vld [vmem:[#allocation18_spill] sm:$0xff]  ;;  %v2885_v11 = vld [vmem:[#allocation19_spill] sm:$0xff] }
 0x173   : > { %1355 = vmatpush.msra.mxu3 %v1257_v51  ;;  %v1165_v62 = vadd.f32 %v1161_v20, %v1076_v60  ;;  %v975_v32 = vmul.f32 %v971_v4, %v2871_v25  ;;  %v616_v30 = vperm.slane %v2872_v2, 1  ;;  %v705_v48 = vperm.slane %v2873_v13, 1  ;;  %v2879_v51 = vld [vmem:[#allocation33_spill] sm:$0xff]  ;;  %v2880_v25 = vld [vmem:[#allocation34_spill] sm:$0xff] }
 0x174   : > { %v1077_v47 = vadd.f32 %v1073_v49, %v988_v29  ;;  %v801_v55 = vadd.f32 %v797_v24, %v712_v18  ;;  %v1060_v33 = vperm.slane %v2874_v17, 1  ;;  %v1149_v15 = vperm.slane %v2875_v9, 1  ;;  %v2881_v29 = vld [vmem:[#allocation35_spill] sm:$0xff]  ;;  %v2882_v24 = vld [vmem:[#allocation36_spill] sm:$0xff]  ;;  %v2883_v9 = vld [vmem:[#allocation37_spill] sm:$0xff] }
 0x175   : > { %v1254_v59 = vadd.f32 %v1250_v61, %v1165_v62  ;;  %v1238_v0 = vperm.slane %v2876_v23, 1  ;;  %v620_v14 = vmul.f32 %v616_v30, %v2877_v57  ;;  %v709_v45 = vmul.f32 %v705_v48, %v2878_v34  ;;  %v2884_v13 = vld [vmem:[#allocation14_spill] sm:$0xff] }
 0x176   : > { %v1166_v20 = vadd.f32 %v1162_v8, %v1077_v47  ;;  %v890_v12 = vadd.f32 %v886_v28, %v801_v55  ;;  %v794_v60 = vperm.slane %v2879_v51, 1  ;;  %v883_v2 = vperm.slane %v2880_v25, 1  ;;  %v2886_v8 = vld [vmem:[#allocation15_spill] sm:$0xff]  ;;  %v2887_v47 = vld [vmem:[#allocation20_spill] sm:$0xff]  ;;  %v2888_v51 = vld [vmem:[#allocation30_spill] sm:$0xff] }
 0x177   : > { %1333 = vmatpush.msra.mxu2 %v1254_v59  ;;  %v713_v49 = vadd.f32 %v709_v45, %v620_v14  ;;  %v972_v18 = vperm.slane %v2881_v29, 1  ;;  %v1061_v17 = vperm.slane %v2882_v24, 1  ;;  %v1150_v61 = vperm.slane %v2883_v9, 1  ;;  %v2889_v9 = vld [vmem:[#allocation16_spill] sm:$0xff] }
 0x178   : > { %v1255_v62 = vadd.f32 %v1251_v22, %v1166_v20  ;;  %v979_v23 = vadd.f32 %v975_v32, %v890_v12  ;;  %v1064_v57 = vmul.f32 %v1060_v33, %v2884_v13  ;;  %v798_v34 = vmul.f32 %v794_v60, %v2885_v11  ;;  %v2890_v12 = vld [vmem:[#allocation23_spill] sm:$0xff] }
 0x179   : > { %v1153_v28 = vmul.f32 %v1149_v15, %v2886_v8  ;;  %v887_v55 = vmul.f32 %v883_v2, %v2887_v47  ;;  %v1239_v25 = vperm.slane %v2888_v51, 1  ;;  %v617_v45 = vmul.f32 %v615_v54, %v2106_v35 }
 0x17a   : > { %1356 = vmatpush.msra.mxu3 %v1255_v62  ;;  %v1068_v59 = vadd.f32 %v1064_v57, %v979_v23  ;;  %v802_v14 = vadd.f32 %v798_v34, %v713_v49  ;;  %v706_v24 = vmul.f32 %v704_v43, %v2108_v40  ;;  %v1242_v22 = vmul.f32 %v1238_v0, %v2889_v9  ;;  %v2891_v62 = vld [vmem:[#allocation24_spill] sm:$0xff] }
 0x17b   : > { %v976_v32 = vmul.f32 %v972_v18, %v2780_v5  ;;  %v1065_v20 = vmul.f32 %v1061_v17, %v2781_v42  ;;  %v1154_v11 = vmul.f32 %v1150_v61, %v2890_v12  ;;  %v795_v51 = vmul.f32 %v793_v1, %v2110_v41 }
 0x17c   : > { %v1157_v8 = vadd.f32 %v1153_v28, %v1068_v59  ;;  %v891_v13 = vadd.f32 %v887_v55, %v802_v14  ;;  %v710_v47 = vadd.f32 %v706_v24, %v617_v45  ;;  %v1243_v23 = vmul.f32 %v1239_v25, %v2891_v62 }
 0x17d   : > { %v884_v57 = vmul.f32 %v882_v53, %v2112_v36  ;;  %v618_v54 = vmul.f32 %v616_v30, %v2122_v44  ;;  %v707_v43 = vmul.f32 %v705_v48, %v2124_v16  ;;  %v973_v42 = vmul.f32 %v971_v4, %v2114_v37 }
 0x17e   : > { %v1246_v34 = vadd.f32 %v1242_v22, %v1157_v8  ;;  %v980_v49 = vadd.f32 %v976_v32, %v891_v13  ;;  %v799_v5 = vadd.f32 %v795_v51, %v710_v47  ;;  %v1062_v12 = vmul.f32 %v1060_v33, %v2116_v38  ;;  %v2892_v22 = vld [vmem:[#allocation12_spill] sm:$0xff]  ;;  %v2893_v32 = vld [vmem:[#allocation31_spill] sm:$0xff] }
 0x17f   : > { %v1151_v28 = vmul.f32 %v1149_v15, %v2118_v21  ;;  %v711_v24 = vadd.f32 %v707_v43, %v618_v54  ;;  %v796_v1 = vmul.f32 %v794_v60, %v2126_v10  ;;  %v1240_v53 = vmul.f32 %v1238_v0, %v2120_v39  ;;  %v2895_v54 = vld [vmem:[#allocation13_spill] sm:$0xff] }
 0x180   : > { %1334 = vmatpush.msra.mxu2 %v1246_v34  ;;  %v1069_v55 = vadd.f32 %v1065_v20, %v980_v49  ;;  %v888_v59 = vadd.f32 %v884_v57, %v799_v5  ;;  %v885_v30 = vmul.f32 %v883_v2, %v2128_v3  ;;  %v605_v13 = vperm.slane %v2134_v52, 0  ;;  %v2894_v20 = vld [vmem:[#allocation32_spill] sm:$0xff]  ;;  %v2897_v34 = vld [vmem:[#allocation27_spill] sm:$0xff] }
 0x181   : > { %v800_v48 = vadd.f32 %v796_v1, %v711_v24  ;;  %v694_v51 = vperm.slane %v2138_v56, 0  ;;  %v783_v4 = vperm.slane %v2142_v6, 0  ;;  %v974_v15 = vmul.f32 %v972_v18, %v2130_v58 }
 0x182   : > { %v1158_v33 = vadd.f32 %v1154_v11, %v1069_v55  ;;  %v977_v8 = vadd.f32 %v973_v42, %v888_v59  ;;  %v872_v60 = vperm.slane %v2150_v19, 0  ;;  %v609_v5 = vmul.f32 %v605_v13, %v2066_v50 }
 0x183   : > { %v889_v47 = vadd.f32 %v885_v30, %v800_v48  ;;  %v698_v0 = vmul.f32 %v694_v51, %v2760_v63  ;;  %v961_v2 = vperm.slane %v2154_v46, 0  ;;  %v1063_v52 = vmul.f32 %v1061_v17, %v2144_v7  ;;  %v2900_v30 = vld [vmem:[#allocation33_spill] sm:$0xff] }
 0x184   : > { %v1247_v14 = vadd.f32 %v1243_v23, %v1158_v33  ;;  %v1066_v45 = vadd.f32 %v1062_v12, %v977_v8  ;;  %v1152_v56 = vmul.f32 %v1150_v61, %v2761_v27  ;;  %v1241_v42 = vmul.f32 %v1239_v25, %v2762_v26  ;;  %v2896_v61 = vld [vmem:[#allocation26_spill] sm:$0xff] }
 0x185   : > { %v978_v6 = vadd.f32 %v974_v15, %v889_v47  ;;  %v702_v11 = vadd.f32 %v698_v0, %v609_v5  ;;  %v787_v18 = vmul.f32 %v783_v4, %v2782_v31  ;;  %v876_v50 = vmul.f32 %v872_v60, %v2892_v22  ;;  %v2898_v31 = vld [vmem:[#allocation17_spill] sm:$0xff]  ;;  %v2901_v33 = vld [vmem:[#allocation34_spill] sm:$0xff] }
 0x186   : > { %1357 = vmatpush.msra.mxu3 %v1247_v14  ;;  %v1155_v19 = vadd.f32 %v1151_v28, %v1066_v45  ;;  %v606_v63 = vperm.slane %v2893_v32, 0  ;;  %v695_v57 = vperm.slane %v2894_v20, 0  ;;  %v965_v17 = vmul.f32 %v961_v2, %v2895_v54  ;;  %v2899_v28 = vld [vmem:[#allocation18_spill] sm:$0xff]  ;;  %v2902_v15 = vld [vmem:[#allocation25_spill] sm:$0xff] }
 0x187   : > { %v1067_v23 = vadd.f32 %v1063_v52, %v978_v6  ;;  %v791_v12 = vadd.f32 %v787_v18, %v702_v11  ;;  %v1050_v43 = vperm.slane %v2896_v61, 0  ;;  %v1139_v49 = vperm.slane %v2897_v34, 0  ;;  %v2903_v45 = vld [vmem:[#allocation14_spill] sm:$0xff]  ;;  %v2904_v6 = vld [vmem:[#allocation19_spill] sm:$0xff]  ;;  %v2909_v61 = vld [vmem:[#allocation37_spill] sm:$0xff] }
 0x188   : > { %v1244_v25 = vadd.f32 %v1240_v53, %v1155_v19  ;;  %v610_v24 = vmul.f32 %v606_v63, %v2898_v31  ;;  %v699_v1 = vmul.f32 %v695_v57, %v2899_v28  ;;  %v784_v48 = vperm.slane %v2900_v30, 0  ;;  %v2905_v18 = vld [vmem:[#allocation15_spill] sm:$0xff] }
 0x189   : > { %v1156_v55 = vadd.f32 %v1152_v56, %v1067_v23  ;;  %v880_v59 = vadd.f32 %v876_v50, %v791_v12  ;;  %v873_v8 = vperm.slane %v2901_v33, 0  ;;  %v1228_v47 = vperm.slane %v2902_v15, 0  ;;  %v2906_v56 = vld [vmem:[#allocation20_spill] sm:$0xff] }
 0x18a   : > { %1335 = vmatpush.msra.mxu2 %v1244_v25  ;;  %v703_v5 = vadd.f32 %v699_v1, %v610_v24  ;;  %v962_v0 = vperm.slane %v2881_v29, 0  ;;  %v1054_v52 = vmul.f32 %v1050_v43, %v2903_v45  ;;  %v788_v11 = vmul.f32 %v784_v48, %v2904_v6  ;;  %v2907_v50 = vld [vmem:[#allocation36_spill] sm:$0xff]  ;;  %v2910_v1 = vld [vmem:[#allocation22_spill] sm:$0xff] }
 0x18b   : > { %v1245_v14 = vadd.f32 %v1241_v42, %v1156_v55  ;;  %v969_v53 = vadd.f32 %v965_v17, %v880_v59  ;;  %v1143_v19 = vmul.f32 %v1139_v49, %v2905_v18  ;;  %v877_v22 = vmul.f32 %v873_v8, %v2906_v56  ;;  %v2908_v42 = vld [vmem:[#allocation21_spill] sm:$0xff]  ;;  %v2911_v59 = vld [vmem:[#allocation30_spill] sm:$0xff] }
 0x18c   : > { %v1051_v32 = vperm.slane %v2907_v50, 0  ;;  %v792_v23 = vadd.f32 %v788_v11, %v703_v5  ;;  %v607_v12 = vmul.f32 %v605_v13, %v2106_v35  ;;  %v696_v54 = vmul.f32 %v694_v51, %v2108_v40 }
 0x18d   : > { %1358 = vmatpush.msra.mxu3 %v1245_v14  ;;  %v1058_v20 = vadd.f32 %v1054_v52, %v969_v53  ;;  %v1232_v29 = vmul.f32 %v1228_v47, %v2889_v9  ;;  %v966_v17 = vmul.f32 %v962_v0, %v2908_v42  ;;  %v1140_v25 = vperm.slane %v2909_v61, 0  ;;  %v2912_v53 = vld [vmem:[#allocation23_spill] sm:$0xff] }
 0x18e   : > { %v881_v31 = vadd.f32 %v877_v22, %v792_v23  ;;  %v700_v24 = vadd.f32 %v696_v54, %v607_v12  ;;  %v785_v28 = vmul.f32 %v783_v4, %v2110_v41  ;;  %v1055_v55 = vmul.f32 %v1051_v32, %v2910_v1 }
 0x18f   : > { %v1147_v34 = vadd.f32 %v1143_v19, %v1058_v20  ;;  %v1229_v30 = vperm.slane %v2911_v59, 0  ;;  %v608_v33 = vmul.f32 %v606_v63, %v2122_v44  ;;  %v697_v35 = vmul.f32 %v695_v57, %v2124_v16  ;;  %v1320_v20 = vpop.permute.xlu0 %1319 }
 0x190   : > { %v970_v13 = vadd.f32 %v966_v17, %v881_v31  ;;  %v789_v9 = vadd.f32 %v785_v28, %v700_v24  ;;  %v874_v51 = vmul.f32 %v872_v60, %v2112_v36  ;;  %v786_v5 = vmul.f32 %v784_v48, %v2126_v10  ;;  %v1382_v17 = vld [vmem:[%s2598_s18 + $0x10] sm:$0xff]  ;;  %v1383_v28 = vld [vmem:[%s2598_s18 + $0x18] sm:$0xff] }
 0x191   : > { %v1236_v40 = vadd.f32 %v1232_v29, %v1147_v34  ;;  %v701_v15 = vadd.f32 %v697_v35, %v608_v33  ;;  %v1144_v41 = vmul.f32 %v1140_v25, %v2912_v53  ;;  %v963_v45 = vmul.f32 %v961_v2, %v2114_v37 }
 0x192   : > { %v1059_v14 = vadd.f32 %v1055_v55, %v970_v13  ;;  %v878_v4 = vadd.f32 %v874_v51, %v789_v9  ;;  %v875_v16 = vmul.f32 %v873_v8, %v2128_v3  ;;  %v1233_v57 = vmul.f32 %v1229_v30, %v2891_v62 }
 0x193   : > { %1336 = vmatpush.msra.mxu2 %v1236_v40  ;;  %v790_v44 = vadd.f32 %v786_v5, %v701_v15  ;;  %v1052_v36 = vmul.f32 %v1050_v43, %v2116_v38  ;;  %v964_v10 = vmul.f32 %v962_v0, %v2130_v58  ;;  %v1141_v11 = vmul.f32 %v1139_v49, %v2118_v21  ;;  %v1308_v58 = vld [vmem:[%s2648_s5] sm:$0xff] }
 0x194   : > { %v1148_v63 = vadd.f32 %v1144_v41, %v1059_v14  ;;  %v967_v52 = vadd.f32 %v963_v45, %v878_v4  ;;  %v1053_v46 = vmul.f32 %v1051_v32, %v2144_v7  ;;  %v1230_v3 = vmul.f32 %v1228_v47, %v2120_v39  ;;  %v1309_v39 = vld [vmem:[%s2648_s5 + $0x8] sm:$0xff]  ;;  %v1315_v7 = vpop.permute.xlu2 %1314  ;;  %v1380_v47 = vld [vmem:[%s2598_s18] sm:$0xff] }
 0x195   : > { %v879_v60 = vadd.f32 %v875_v16, %v790_v44  ;;  %v1142_v62 = vmul.f32 %v1140_v25, %v2761_v27  ;;  %v1231_v21 = vmul.f32 %v1229_v30, %v2762_v26  ;;  %v1381_v32 = vld [vmem:[%s2598_s18 + $0x8] sm:$0xff] }
 0x196   : > { %v1237_v48 = vadd.f32 %v1233_v57, %v1148_v63  ;;  %v1056_v6 = vadd.f32 %v1052_v36, %v967_v52 }
 0x197   : > { %v968_v18 = vadd.f32 %v964_v10, %v879_v60 }
 0x198   : > { %1359 = vmatpush.msra.mxu3 %v1237_v48  ;;  %v1145_v37 = vadd.f32 %v1141_v11, %v1056_v6 }
 0x199   : > { %v1057_v2 = vadd.f32 %v1053_v46, %v968_v18 }
 0x19a   : > { %v1234_v8 = vadd.f32 %v1230_v3, %v1145_v37 }
 0x19b   : > { %v1146_v38 = vadd.f32 %v1142_v62, %v1057_v2 }
 0x19c   : > { %1337 = vmatpush.msra.mxu2 %v1234_v8 }
 0x19d   : > { %v1235_v43 = vadd.f32 %v1231_v21, %v1146_v38  ;;  %1338 = vmatmul.f32.vlgmr.msra.gmra.mxu2 %v1308_v58 }
 0x19f   : > { %1360 = vmatpush.msra.mxu3 %v1235_v43 }
 0x1a0   : > { %1361 = vmatmul.f32.vlgmr.msra.gmra.mxu3 %v1308_v58 }
 0x1a5   : > { %1341 = vmatmul.f32.gmra.mxu2 %v1309_v39 }
 0x1a8   : > { %1364 = vmatmul.f32.gmra.mxu3 %v1309_v39 }
 0x220   : > { %v1339_v27 = vpop.f32.mrf.mxu2 }
 0x221   : > { %v1340_v26 = vadd.f32 %v1339_v27, %v1315_v7 }
 0x223   : > { %vm1368_vm1 = vcmp.gt.f32.partialorder %v1340_v26, 0.0  ;;  %v1372_v49 = vmul.f32 0.2, %v1340_v26  ;;  %v1362_v0 = vpop.f32.mrf.mxu3 }
 0x224   : > { %v1363_v19 = vadd.f32 %v1362_v0, %v1315_v7 }
 0x225   : > { %v1376_v56 = vsel %vm1368_vm1, %v1340_v26, %v1372_v49 }
 0x226   : > { %v1384_v22 = vadd.f32 %v1380_v47, %v1376_v56  ;;  %vm1369_vm2 = vcmp.gt.f32.partialorder %v1363_v19, 0.0  ;;  %v1373_v50 = vmul.f32 0.2, %v1363_v19 }
 0x228   : > { %1388 = vst [vmem:[%s368_s9] sm:$0xff] %v1384_v22  ;;  %v1377_v23 = vsel %vm1369_vm2, %v1363_v19, %v1373_v50  ;;  %v1342_v12 = vpop.f32.mrf.mxu2 }
 0x229   : > { %v1385_v54 = vadd.f32 %v1381_v32, %v1377_v23  ;;  %v1343_v29 = vadd.f32 %v1342_v12, %v1320_v20 }
 0x22b   : > { %1389 = vst [vmem:[%s368_s9 + $0x8] sm:$0xff] %v1385_v54  ;;  %vm1370_vm3 = vcmp.gt.f32.partialorder %v1343_v29, 0.0  ;;  %v1374_v42 = vmul.f32 0.2, %v1343_v29  ;;  %v1365_v61 = vpop.f32.mrf.mxu3 }
 0x22c   : > { %v1366_v25 = vadd.f32 %v1365_v61, %v1320_v20 }
 0x22d   : > { %v1378_v34 = vsel %vm1370_vm3, %v1343_v29, %v1374_v42 }
 0x22e   : > { %v1386_v31 = vadd.f32 %v1382_v17, %v1378_v34  ;;  %vm1371_vm4 = vcmp.gt.f32.partialorder %v1366_v25, 0.0  ;;  %v1375_v24 = vmul.f32 0.2, %v1366_v25 }
 0x230   : > { %1390 = vst [vmem:[%s368_s9 + $0x10] sm:$0xff] %v1386_v31  ;;  %v1379_v1 = vsel %vm1371_vm4, %v1366_v25, %v1375_v24 }
 0x231   : > { %v1387_v55 = vadd.f32 %v1383_v28, %v1379_v1 }
 0x233   : > { %1391 = vst [vmem:[%s368_s9 + $0x18] sm:$0xff] %v1387_v55 }
 0x234   : > { %1716 = shalt.err (!%p1713_p0)
}
 0x235   : > { %s1776_s28 = smov 256   ;;  %s1777_s9 = smov 16  }
 0x236   : > { %1587 = dma.vmem_to_hbm [thread:$0]  (%p1869_p9), %s1408_s20, 512, %s1410_s27, %s1393_s13, %s1776_s28, %s1776_s28, %s1777_s9  }
 0x237 PF: > { %s1424_s11 = sand.u32 1, %s1751_s24   ;;  %p1594_p1 = pnand %p1536_p12, %p1876_p11 }
 0x238   : > { %s1425_s17 = scalar_lea.sflag [#allocation4], %s1424_s11 }
 0x239   : > { %p1595_p2 = pneg %p1594_p1 }
 0x23b   : > { %1746 = dma.done.wait (%p1595_p2), %s1425_s17, 512  }
 0x23c   : > { %1748 = vsyncadd (%p1595_p2), %s1425_s17, 4294966784  ;;  %s23_s29 = sadd.s32 1, %s1771_s29   ;;  %s2913_s27 = sld [smem:[#allocation8_spill]] }
 0x23d   : > { %p20_p3 = scmp.ge.s32.totalorder %s23_s29, 4   ;;  %s2914_s28 = sld [smem:[#allocation9_spill]] }
 0x23e   : > { %s2915_s24 = smov %s1755_s25  ;;  %s2916_s25 = smov %s1759_s26 }
 0x23f   : > { %s2917_s26 = smov %s1874_s15  ;;  %22 = sbr.rel (!%p20_p3) target bundleno = 6 (0x6), region = 106 }
 0x244   :  { %1431 = vsyncpa [#allocation3], 1 }
 0x245   :  { %1433 = vsyncpa [#allocation3 + $0x1], 1 }
 0x246   :  { %1434 = vsyncpa [#allocation4], 1 }
 0x247   :  { %1436 = vsyncpa [#allocation4 + $0x1], 1 }

</bundles_post_ra>
